<compile_context>
chip_gen: v7x
topology: tpu7x:2x2x1
jax: 0.10.0
libtpu: 0.0.40
codegen_flags: <defaults>
</compile_context>

<pallas_src>
import jax
import jax.numpy as jnp
from jax.experimental import pallas as pl
from jax.experimental.pallas import tpu as pltpu

# ---- model hyperparameters (small, consistent with the module) --------------
N_VOCAB = 20
EMBED_DIM = 32            # must equal 2 * HIDDEN
HIDDEN = 16
NUM_LAYERS = 1            # TODO(synk): num_layers>1 stacked LSTM (+ inter-layer dropout) not implemented
NUM_FILTERS = 8
FILTER_SIZES = (2, 3, 4)
BATCH = 2
SEQ = 8
PRICE_DIM = 3

H2 = 2 * HIDDEN                        # 32  (bidirectional hidden width == EMBED_DIM)
G8 = 8 * HIDDEN                        # 128 (4 gates x 2 directions)
K_MAX = max(FILTER_SIZES)              # 4
N_POS = SEQ - min(FILTER_SIZES) + 1    # 7 window positions (max over filter sizes)
S_PAD = N_POS + K_MAX - 1              # 10 padded time steps held in scratch
NF_TOT = NUM_FILTERS * len(FILTER_SIZES)   # 24

VMEM = pl.BlockSpec(memory_space=pltpu.MemorySpace.VMEM)
SMEM = pl.BlockSpec(memory_space=pltpu.MemorySpace.SMEM)


# ---- the single fused kernel --------------------------------------------------
def _fused_kernel(x_ref, wih_ref, whh_ref, bias_ref,
                  convw_ref, convb_ref, mask_ref,
                  fcw_ref, fcb_ref, fc1w_ref, fc1b_ref,
                  period_ref, value_ref,
                  out_ref, lstm_scr):
    B = BATCH
    H = HIDDEN

    # ---- 1) bidirectional LSTM -------------------------------------------------
    # Hoisted input projection: both directions, all gates, all timesteps at once.
    # x_ref row t*B+b = [x(b,t) | x(b,S-1-t)], wih is block-diagonal per direction.
    xproj = (jnp.dot(x_ref[...], wih_ref[...],
                     preferred_element_type=jnp.float32) + bias_ref[...])   # (S*B, 128)

    whh = whh_ref[...]                         # (2H, 8H) block-diagonal per direction

    # Zero the scratch so padded time rows feed zeros into the conv windows.
    lstm_scr[...] = jnp.zeros_like(lstm_scr)

    h = jnp.zeros((B, H2), jnp.float32)        # [h_fwd | h_bwd]
    c = jnp.zeros((B, H2), jnp.float32)
    # Fully unrolled serial recurrence: one (B,2H)@(2H,128) matmul per step.
    for t in range(SEQ):
        gates = xproj[t * B:(t + 1) * B, :] + jnp.dot(
            h, whh, preferred_element_type=jnp.float32)                    # (B, 128)
        i = jax.nn.sigmoid(gates[:, 0 * H2:1 * H2])
        f = jax.nn.sigmoid(gates[:, 1 * H2:2 * H2])
        g = jnp.tanh(gates[:, 2 * H2:3 * H2])
        o = jax.nn.sigmoid(gates[:, 3 * H2:4 * H2])
        c = f * c + i * g
        h = o * jnp.tanh(c)
        # forward half of h is the output at time t, backward half at time S-1-t
        lstm_scr[t * B:(t + 1) * B, 0:H] = h[:, 0:H]
        lstm_scr[(SEQ - 1 - t) * B:(SEQ - t) * B, H:H2] = h[:, H:H2]

    # ---- 2) conv + ReLU + max-pool-over-time (all 3 filter sizes in one matmul) --
    # im2col windows: row p*B+b = [lstm(p,b), lstm(p+1,b), lstm(p+2,b), lstm(p+3,b)]
    win = jnp.concatenate(
        [lstm_scr[w * B:(w + N_POS) * B, :] for w in range(K_MAX)], axis=-1)  # (N_POS*B, 128)
    conv = jnp.dot(win, convw_ref[...],
                   preferred_element_type=jnp.float32) + convb_ref[...]       # (N_POS*B, 3F)
    conv = jnp.maximum(conv, 0.0) + mask_ref[...]   # ReLU, then mask invalid positions (-1e30)
    feats = conv[0:B, :]                            # max-pool over time positions
    for p in range(1, N_POS):
        feats = jnp.maximum(feats, conv[p * B:(p + 1) * B, :])                # (B, 3F)

    # ---- 3) head: fc -> tanh -> * exp(-value*period/30) -> fc1 -> tanh ----------
    h1 = jnp.tanh(jnp.dot(feats, fcw_ref[...],
                          preferred_element_type=jnp.float32) + fcb_ref[...])
    scale = jnp.exp(period_ref[...] * (-value_ref[0, 0] / 30.0))              # (B, 1)
    h1 = h1 * scale
    out_ref[...] = jnp.tanh(jnp.dot(h1, fc1w_ref[...],
                                    preferred_element_type=jnp.float32) + fc1b_ref[...])


# ---- parameters (deterministic, synthetic) -------------------------------------
def init_params(key):
    keys = jax.random.split(key, 20)
    p = {}
    p["embedding"] = jax.random.normal(keys[0], (N_VOCAB, EMBED_DIM), jnp.float32) * 0.5

    def lstm_dir(k1, k2, k3, k4):
        wih = jax.random.normal(k1, (4, EMBED_DIM, HIDDEN), jnp.float32) * 0.1   # per-gate (D, H)
        whh = jax.random.normal(k2, (4, HIDDEN, HIDDEN), jnp.float32) * 0.1
        b_ih = jax.random.normal(k3, (4, 1, HIDDEN), jnp.float32) * 0.1
        b_hh = jax.random.normal(k4, (4, 1, HIDDEN), jnp.float32) * 0.1
        return wih, whh, b_ih + b_hh          # gate order i, f, g, o

    p["lstm_f"] = lstm_dir(keys[1], keys[2], keys[3], keys[4])
    p["lstm_b"] = lstm_dir(keys[5], keys[6], keys[7], keys[8])

    convs = []
    for idx, k in enumerate(FILTER_SIZES):
        # PyTorch Conv2d weight (F, 1, k, D); stored here as (k, D, F)
        wk = jax.random.normal(keys[9 + idx], (k, EMBED_DIM, NUM_FILTERS), jnp.float32) * 0.1
        bk = jax.random.normal(keys[12 + idx], (1, NUM_FILTERS), jnp.float32) * 0.1
        convs.append((wk, bk))
    p["convs"] = convs

    p["fc_w"] = jax.random.normal(keys[15], (NF_TOT, HIDDEN), jnp.float32) * 0.1
    p["fc_b"] = jax.random.normal(keys[16], (1, HIDDEN), jnp.float32) * 0.1
    p["fc1_w"] = jax.random.normal(keys[17], (HIDDEN, HIDDEN), jnp.float32) * 0.1
    p["fc1_b"] = jax.random.normal(keys[18], (1, HIDDEN), jnp.float32) * 0.1
    p["value"] = jnp.ones((1, 1), jnp.float32)   # the learnable scalar `self.value`
    return p


def pack_params(p):
    """Assemble MXU-friendly fused layouts once, outside the kernel/jit hot path."""
    wih_f, whh_f, b_f = p["lstm_f"]
    wih_b, whh_b, b_b = p["lstm_b"]
    zdh = jnp.zeros((EMBED_DIM, HIDDEN), jnp.float32)
    zhh = jnp.zeros((HIDDEN, HIDDEN), jnp.float32)
    wih_cols, whh_cols, b_cols = [], [], []
    for g in range(4):   # gate order i, f, g, o; per gate columns = [fwd H | bwd H]
        wih_cols.append(jnp.concatenate(
            [jnp.concatenate([wih_f[g], zdh], axis=0),
             jnp.concatenate([zdh, wih_b[g]], axis=0)], axis=1))        # (2D, 2H)
        whh_cols.append(jnp.concatenate(
            [jnp.concatenate([whh_f[g], zhh], axis=0),
             jnp.concatenate([zhh, whh_b[g]], axis=0)], axis=1))        # (2H, 2H)
        b_cols.append(jnp.concatenate([b_f[g], b_b[g]], axis=1))        # (1, 2H)
    packed = {
        "wih_big": jnp.concatenate(wih_cols, axis=1),    # (2D, 8H) = (64, 128)
        "whh_big": jnp.concatenate(whh_cols, axis=1),    # (2H, 8H) = (32, 128)
        "bias_big": jnp.concatenate(b_cols, axis=1),     # (1, 8H)  = (1, 128)
    }
    # Conv filters zero-padded to K_MAX rows, stacked along output channels.
    convw_blocks, convb_blocks = [], []
    for (wk, bk), k in zip(p["convs"], FILTER_SIZES):
        wpad = jnp.zeros((K_MAX, EMBED_DIM, NUM_FILTERS), jnp.float32).at[:k].set(wk)
        convw_blocks.append(wpad.reshape(K_MAX * EMBED_DIM, NUM_FILTERS))
        convb_blocks.append(bk)
    packed["convw_big"] = jnp.concatenate(convw_blocks, axis=1)   # (128, 3F)
    packed["convb_big"] = jnp.concatenate(convb_blocks, axis=1)   # (1, 3F)
    # -1e30 mask for window positions beyond each filter's valid range.
    pos = jnp.arange(N_POS, dtype=jnp.float32)
    mask_cols = [jnp.tile((-1e30 * (pos > (SEQ - k)).astype(jnp.float32))[:, None],
                          (1, NUM_FILTERS)) for k in FILTER_SIZES]
    packed["conv_mask"] = jnp.repeat(jnp.concatenate(mask_cols, axis=1),
                                     BATCH, axis=0)               # (N_POS*B, 3F)
    packed["embedding"] = p["embedding"]
    packed["fc_w"], packed["fc_b"] = p["fc_w"], p["fc_b"]
    packed["fc1_w"], packed["fc1_b"] = p["fc1_w"], p["fc1_b"]
    packed["value"] = p["value"]
    return packed


# ---- forward pass ----------------------------------------------------------------
def cnn_layer_forward(packed, tokens, period, price):
    B, S = tokens.shape

    # embedding gather + layout prep (glue, plain JAX)
    emb = packed["embedding"][tokens]                       # (B, S, D)
    emb_t = jnp.transpose(emb, (1, 0, 2))                   # (S, B, D), time-major
    # row t*B+b = [x(b, t) | x(b, S-1-t)]: one matmul projects both directions
    x_in = jnp.concatenate([emb_t, emb_t[::-1]], axis=-1).reshape(S * B, 2 * EMBED_DIM)

    cost = pl.CostEstimate(flops=500_000, transcendentals=3_000, bytes_accessed=72_000)
    h2 = pl.pallas_call(
        _fused_kernel,
        out_shape=jax.ShapeDtypeStruct((B, HIDDEN), jnp.float32),
        in_specs=[VMEM] * 12 + [SMEM],
        out_specs=VMEM,
        scratch_shapes=[pltpu.VMEM((S_PAD * BATCH, H2), jnp.float32)],
        cost_estimate=cost,
    )(x_in, packed["wih_big"], packed["whh_big"], packed["bias_big"],
      packed["convw_big"], packed["convb_big"], packed["conv_mask"],
      packed["fc_w"], packed["fc_b"], packed["fc1_w"], packed["fc1_b"],
      period.reshape(B, 1).astype(jnp.float32), packed["value"])

    # final torch.cat((out, price), 1) — glue concat in plain JAX
    return jnp.concatenate([h2, price], axis=1)             # (B, HIDDEN + PRICE_DIM)


if __name__ == "__main__":
    key = jax.random.PRNGKey(0)
    kp, kx, kper, kpr = jax.random.split(key, 4)
    params = pack_params(init_params(kp))

    tokens = jax.random.randint(kx, (BATCH, SEQ), 0, N_VOCAB, dtype=jnp.int32)
    period = jax.random.uniform(kper, (BATCH,), jnp.float32, 1.0, 30.0)
    price = jax.random.normal(kpr, (BATCH, PRICE_DIM), jnp.float32)

    out = jax.jit(cnn_layer_forward)(params, tokens, period, price)
    out = jax.block_until_ready(out)
    assert out.shape == (BATCH, HIDDEN + PRICE_DIM)
    assert out.dtype == jnp.float32
    print("KERNEL_OK")
</pallas_src>

<mosaic_0001>
module attributes {stable_mosaic.version = 11 : i64} {
  func.func @_fused_kernel(%arg0: memref<16x64xf32, #tpu.memory_space<vmem>>, %arg1: memref<64x128xf32, #tpu.memory_space<vmem>>, %arg2: memref<32x128xf32, #tpu.memory_space<vmem>>, %arg3: memref<1x128xf32, #tpu.memory_space<vmem>>, %arg4: memref<128x24xf32, #tpu.memory_space<vmem>>, %arg5: memref<1x24xf32, #tpu.memory_space<vmem>>, %arg6: memref<14x24xf32, #tpu.memory_space<vmem>>, %arg7: memref<24x16xf32, #tpu.memory_space<vmem>>, %arg8: memref<1x16xf32, #tpu.memory_space<vmem>>, %arg9: memref<16x16xf32, #tpu.memory_space<vmem>>, %arg10: memref<1x16xf32, #tpu.memory_space<vmem>>, %arg11: memref<2x1xf32, #tpu.memory_space<vmem>>, %arg12: memref<1x1xf32, #tpu.memory_space<smem>>, %arg13: memref<2x16xf32, #tpu.memory_space<vmem>>, %arg14: memref<20x32xf32, #tpu.memory_space<vmem>>) attributes {dimension_semantics = [], scalar_prefetch = 0 : i64, scratch_operands = 1 : i64, tpu.core_type = #tpu.core_type<tc>} {
    %c0 = arith.constant 0 : index
    %c0_0 = arith.constant 0 : index
    %0 = vector.load %arg0[%c0, %c0_0] : memref<16x64xf32, #tpu.memory_space<vmem>>, vector<16x64xf32>
    %c0_1 = arith.constant 0 : index
    %c0_2 = arith.constant 0 : index
    %1 = vector.load %arg1[%c0_1, %c0_2] : memref<64x128xf32, #tpu.memory_space<vmem>>, vector<64x128xf32>
    %cst = arith.constant dense<0.000000e+00> : vector<16x128xf32>
    %2 = tpu.matmul %0, %1, %cst {dimension_numbers = #tpu.dot_dimension_numbers<[1], [0], [0], [1], [0, 0, 1, 1], [], []>} : vector<16x64xf32>, vector<64x128xf32>, vector<16x128xf32> -> vector<16x128xf32>
    %c0_3 = arith.constant 0 : index
    %c0_4 = arith.constant 0 : index
    %3 = vector.load %arg3[%c0_3, %c0_4] : memref<1x128xf32, #tpu.memory_space<vmem>>, vector<1x128xf32>
    %4 = vector.broadcast %3 : vector<1x128xf32> to vector<16x128xf32>
    %5 = arith.addf %2, %4 : vector<16x128xf32>
    %c0_5 = arith.constant 0 : index
    %c0_6 = arith.constant 0 : index
    %6 = vector.load %arg2[%c0_5, %c0_6] : memref<32x128xf32, #tpu.memory_space<vmem>>, vector<32x128xf32>
    %cst_7 = arith.constant 0.000000e+00 : f32
    %7 = vector.broadcast %cst_7 : f32 to vector<20x32xf32>
    %c0_8 = arith.constant 0 : index
    %c0_9 = arith.constant 0 : index
    %8 = vector.load %arg14[%c0_8, %c0_9] : memref<20x32xf32, #tpu.memory_space<vmem>>, vector<20x32xf32>
    tpu.vector_store %arg14[%c0_8, %c0_9], %7 {strides = array<i32>} : memref<20x32xf32, #tpu.memory_space<vmem>>, vector<20x32xf32>,
    %cst_10 = arith.constant 0.000000e+00 : f32
    %9 = vector.broadcast %cst_10 : f32 to vector<2x32xf32>
    %cst_11 = arith.constant 0.000000e+00 : f32
    %10 = vector.broadcast %cst_11 : f32 to vector<2x32xf32>
    %11 = vector.extract_strided_slice %5 {offsets = [0, 0], sizes = [2, 128], strides = [1, 1]} : vector<16x128xf32> to vector<2x128xf32>
    %cst_12 = arith.constant dense<0.000000e+00> : vector<2x128xf32>
    %12 = tpu.matmul %9, %6, %cst_12 {dimension_numbers = #tpu.dot_dimension_numbers<[1], [0], [0], [1], [0, 0, 1, 1], [], []>} : vector<2x32xf32>, vector<32x128xf32>, vector<2x128xf32> -> vector<2x128xf32>
    %13 = arith.addf %11, %12 : vector<2x128xf32>
    %14 = vector.extract_strided_slice %13 {offsets = [0, 0], sizes = [2, 32], strides = [1, 1]} : vector<2x128xf32> to vector<2x32xf32>
    %15 = arith.negf %14 : vector<2x32xf32>
    %16 = math.exp %15 : vector<2x32xf32>
    %cst_13 = arith.constant 1.000000e+00 : f32
    %17 = vector.broadcast %cst_13 : f32 to vector<2x32xf32>
    %18 = arith.addf %17, %16 : vector<2x32xf32>
    %19 = arith.divf %17, %18 : vector<2x32xf32>
    %20 = vector.extract_strided_slice %13 {offsets = [0, 32], sizes = [2, 32], strides = [1, 1]} : vector<2x128xf32> to vector<2x32xf32>
    %21 = arith.negf %20 : vector<2x32xf32>
    %22 = math.exp %21 : vector<2x32xf32>
    %cst_14 = arith.constant 1.000000e+00 : f32
    %23 = vector.broadcast %cst_14 : f32 to vector<2x32xf32>
    %24 = arith.addf %23, %22 : vector<2x32xf32>
    %25 = arith.divf %23, %24 : vector<2x32xf32>
    %26 = vector.extract_strided_slice %13 {offsets = [0, 64], sizes = [2, 32], strides = [1, 1]} : vector<2x128xf32> to vector<2x32xf32>
    %27 = math.tanh %26 : vector<2x32xf32>
    %28 = vector.extract_strided_slice %13 {offsets = [0, 96], sizes = [2, 32], strides = [1, 1]} : vector<2x128xf32> to vector<2x32xf32>
    %29 = arith.negf %28 : vector<2x32xf32>
    %30 = math.exp %29 : vector<2x32xf32>
    %cst_15 = arith.constant 1.000000e+00 : f32
    %31 = vector.broadcast %cst_15 : f32 to vector<2x32xf32>
    %32 = arith.addf %31, %30 : vector<2x32xf32>
    %33 = arith.divf %31, %32 : vector<2x32xf32>
    %34 = arith.mulf %25, %10 : vector<2x32xf32>
    %35 = arith.mulf %19, %27 : vector<2x32xf32>
    %36 = arith.addf %34, %35 : vector<2x32xf32>
    %37 = math.tanh %36 : vector<2x32xf32>
    %38 = arith.mulf %33, %37 : vector<2x32xf32>
    %39 = vector.extract_strided_slice %38 {offsets = [0, 0], sizes = [2, 16], strides = [1, 1]} : vector<2x32xf32> to vector<2x16xf32>
    %c0_16 = arith.constant 0 : index
    %c0_17 = arith.constant 0 : index
    %40 = vector.load %arg14[%c0_16, %c0_17] : memref<20x32xf32, #tpu.memory_space<vmem>>, vector<2x16xf32>
    tpu.vector_store %arg14[%c0_16, %c0_17], %39 {strides = array<i32>} : memref<20x32xf32, #tpu.memory_space<vmem>>, vector<2x16xf32>,
    %41 = vector.extract_strided_slice %38 {offsets = [0, 16], sizes = [2, 16], strides = [1, 1]} : vector<2x32xf32> to vector<2x16xf32>
    %c14 = arith.constant 14 : index
    %c16 = arith.constant 16 : index
    %42 = vector.load %arg14[%c14, %c16] : memref<20x32xf32, #tpu.memory_space<vmem>>, vector<2x16xf32>
    tpu.vector_store %arg14[%c14, %c16], %41 {strides = array<i32>} : memref<20x32xf32, #tpu.memory_space<vmem>>, vector<2x16xf32>,
    %43 = vector.extract_strided_slice %5 {offsets = [2, 0], sizes = [2, 128], strides = [1, 1]} : vector<16x128xf32> to vector<2x128xf32>
    %cst_18 = arith.constant dense<0.000000e+00> : vector<2x128xf32>
    %44 = tpu.matmul %38, %6, %cst_18 {dimension_numbers = #tpu.dot_dimension_numbers<[1], [0], [0], [1], [0, 0, 1, 1], [], []>} : vector<2x32xf32>, vector<32x128xf32>, vector<2x128xf32> -> vector<2x128xf32>
    %45 = arith.addf %43, %44 : vector<2x128xf32>
    %46 = vector.extract_strided_slice %45 {offsets = [0, 0], sizes = [2, 32], strides = [1, 1]} : vector<2x128xf32> to vector<2x32xf32>
    %47 = arith.negf %46 : vector<2x32xf32>
    %48 = math.exp %47 : vector<2x32xf32>
    %cst_19 = arith.constant 1.000000e+00 : f32
    %49 = vector.broadcast %cst_19 : f32 to vector<2x32xf32>
    %50 = arith.addf %49, %48 : vector<2x32xf32>
    %51 = arith.divf %49, %50 : vector<2x32xf32>
    %52 = vector.extract_strided_slice %45 {offsets = [0, 32], sizes = [2, 32], strides = [1, 1]} : vector<2x128xf32> to vector<2x32xf32>
    %53 = arith.negf %52 : vector<2x32xf32>
    %54 = math.exp %53 : vector<2x32xf32>
    %cst_20 = arith.constant 1.000000e+00 : f32
    %55 = vector.broadcast %cst_20 : f32 to vector<2x32xf32>
    %56 = arith.addf %55, %54 : vector<2x32xf32>
    %57 = arith.divf %55, %56 : vector<2x32xf32>
    %58 = vector.extract_strided_slice %45 {offsets = [0, 64], sizes = [2, 32], strides = [1, 1]} : vector<2x128xf32> to vector<2x32xf32>
    %59 = math.tanh %58 : vector<2x32xf32>
    %60 = vector.extract_strided_slice %45 {offsets = [0, 96], sizes = [2, 32], strides = [1, 1]} : vector<2x128xf32> to vector<2x32xf32>
    %61 = arith.negf %60 : vector<2x32xf32>
    %62 = math.exp %61 : vector<2x32xf32>
    %cst_21 = arith.constant 1.000000e+00 : f32
    %63 = vector.broadcast %cst_21 : f32 to vector<2x32xf32>
    %64 = arith.addf %63, %62 : vector<2x32xf32>
    %65 = arith.divf %63, %64 : vector<2x32xf32>
    %66 = arith.mulf %57, %36 : vector<2x32xf32>
    %67 = arith.mulf %51, %59 : vector<2x32xf32>
    %68 = arith.addf %66, %67 : vector<2x32xf32>
    %69 = math.tanh %68 : vector<2x32xf32>
    %70 = arith.mulf %65, %69 : vector<2x32xf32>
    %71 = vector.extract_strided_slice %70 {offsets = [0, 0], sizes = [2, 16], strides = [1, 1]} : vector<2x32xf32> to vector<2x16xf32>
    %c2 = arith.constant 2 : index
    %c0_22 = arith.constant 0 : index
    %72 = vector.load %arg14[%c2, %c0_22] : memref<20x32xf32, #tpu.memory_space<vmem>>, vector<2x16xf32>
    tpu.vector_store %arg14[%c2, %c0_22], %71 {strides = array<i32>} : memref<20x32xf32, #tpu.memory_space<vmem>>, vector<2x16xf32>,
    %73 = vector.extract_strided_slice %70 {offsets = [0, 16], sizes = [2, 16], strides = [1, 1]} : vector<2x32xf32> to vector<2x16xf32>
    %c12 = arith.constant 12 : index
    %c16_23 = arith.constant 16 : index
    %74 = vector.load %arg14[%c12, %c16_23] : memref<20x32xf32, #tpu.memory_space<vmem>>, vector<2x16xf32>
    tpu.vector_store %arg14[%c12, %c16_23], %73 {strides = array<i32>} : memref<20x32xf32, #tpu.memory_space<vmem>>, vector<2x16xf32>,
    %75 = vector.extract_strided_slice %5 {offsets = [4, 0], sizes = [2, 128], strides = [1, 1]} : vector<16x128xf32> to vector<2x128xf32>
    %cst_24 = arith.constant dense<0.000000e+00> : vector<2x128xf32>
    %76 = tpu.matmul %70, %6, %cst_24 {dimension_numbers = #tpu.dot_dimension_numbers<[1], [0], [0], [1], [0, 0, 1, 1], [], []>} : vector<2x32xf32>, vector<32x128xf32>, vector<2x128xf32> -> vector<2x128xf32>
    %77 = arith.addf %75, %76 : vector<2x128xf32>
    %78 = vector.extract_strided_slice %77 {offsets = [0, 0], sizes = [2, 32], strides = [1, 1]} : vector<2x128xf32> to vector<2x32xf32>
    %79 = arith.negf %78 : vector<2x32xf32>
    %80 = math.exp %79 : vector<2x32xf32>
    %cst_25 = arith.constant 1.000000e+00 : f32
    %81 = vector.broadcast %cst_25 : f32 to vector<2x32xf32>
    %82 = arith.addf %81, %80 : vector<2x32xf32>
    %83 = arith.divf %81, %82 : vector<2x32xf32>
    %84 = vector.extract_strided_slice %77 {offsets = [0, 32], sizes = [2, 32], strides = [1, 1]} : vector<2x128xf32> to vector<2x32xf32>
    %85 = arith.negf %84 : vector<2x32xf32>
    %86 = math.exp %85 : vector<2x32xf32>
    %cst_26 = arith.constant 1.000000e+00 : f32
    %87 = vector.broadcast %cst_26 : f32 to vector<2x32xf32>
    %88 = arith.addf %87, %86 : vector<2x32xf32>
    %89 = arith.divf %87, %88 : vector<2x32xf32>
    %90 = vector.extract_strided_slice %77 {offsets = [0, 64], sizes = [2, 32], strides = [1, 1]} : vector<2x128xf32> to vector<2x32xf32>
    %91 = math.tanh %90 : vector<2x32xf32>
    %92 = vector.extract_strided_slice %77 {offsets = [0, 96], sizes = [2, 32], strides = [1, 1]} : vector<2x128xf32> to vector<2x32xf32>
    %93 = arith.negf %92 : vector<2x32xf32>
    %94 = math.exp %93 : vector<2x32xf32>
    %cst_27 = arith.constant 1.000000e+00 : f32
    %95 = vector.broadcast %cst_27 : f32 to vector<2x32xf32>
    %96 = arith.addf %95, %94 : vector<2x32xf32>
    %97 = arith.divf %95, %96 : vector<2x32xf32>
    %98 = arith.mulf %89, %68 : vector<2x32xf32>
    %99 = arith.mulf %83, %91 : vector<2x32xf32>
    %100 = arith.addf %98, %99 : vector<2x32xf32>
    %101 = math.tanh %100 : vector<2x32xf32>
    %102 = arith.mulf %97, %101 : vector<2x32xf32>
    %103 = vector.extract_strided_slice %102 {offsets = [0, 0], sizes = [2, 16], strides = [1, 1]} : vector<2x32xf32> to vector<2x16xf32>
    %c4 = arith.constant 4 : index
    %c0_28 = arith.constant 0 : index
    %104 = vector.load %arg14[%c4, %c0_28] : memref<20x32xf32, #tpu.memory_space<vmem>>, vector<2x16xf32>
    tpu.vector_store %arg14[%c4, %c0_28], %103 {strides = array<i32>} : memref<20x32xf32, #tpu.memory_space<vmem>>, vector<2x16xf32>,
    %105 = vector.extract_strided_slice %102 {offsets = [0, 16], sizes = [2, 16], strides = [1, 1]} : vector<2x32xf32> to vector<2x16xf32>
    %c10 = arith.constant 10 : index
    %c16_29 = arith.constant 16 : index
    %106 = vector.load %arg14[%c10, %c16_29] : memref<20x32xf32, #tpu.memory_space<vmem>>, vector<2x16xf32>
    tpu.vector_store %arg14[%c10, %c16_29], %105 {strides = array<i32>} : memref<20x32xf32, #tpu.memory_space<vmem>>, vector<2x16xf32>,
    %107 = vector.extract_strided_slice %5 {offsets = [6, 0], sizes = [2, 128], strides = [1, 1]} : vector<16x128xf32> to vector<2x128xf32>
    %cst_30 = arith.constant dense<0.000000e+00> : vector<2x128xf32>
    %108 = tpu.matmul %102, %6, %cst_30 {dimension_numbers = #tpu.dot_dimension_numbers<[1], [0], [0], [1], [0, 0, 1, 1], [], []>} : vector<2x32xf32>, vector<32x128xf32>, vector<2x128xf32> -> vector<2x128xf32>
    %109 = arith.addf %107, %108 : vector<2x128xf32>
    %110 = vector.extract_strided_slice %109 {offsets = [0, 0], sizes = [2, 32], strides = [1, 1]} : vector<2x128xf32> to vector<2x32xf32>
    %111 = arith.negf %110 : vector<2x32xf32>
    %112 = math.exp %111 : vector<2x32xf32>
    %cst_31 = arith.constant 1.000000e+00 : f32
    %113 = vector.broadcast %cst_31 : f32 to vector<2x32xf32>
    %114 = arith.addf %113, %112 : vector<2x32xf32>
    %115 = arith.divf %113, %114 : vector<2x32xf32>
    %116 = vector.extract_strided_slice %109 {offsets = [0, 32], sizes = [2, 32], strides = [1, 1]} : vector<2x128xf32> to vector<2x32xf32>
    %117 = arith.negf %116 : vector<2x32xf32>
    %118 = math.exp %117 : vector<2x32xf32>
    %cst_32 = arith.constant 1.000000e+00 : f32
    %119 = vector.broadcast %cst_32 : f32 to vector<2x32xf32>
    %120 = arith.addf %119, %118 : vector<2x32xf32>
    %121 = arith.divf %119, %120 : vector<2x32xf32>
    %122 = vector.extract_strided_slice %109 {offsets = [0, 64], sizes = [2, 32], strides = [1, 1]} : vector<2x128xf32> to vector<2x32xf32>
    %123 = math.tanh %122 : vector<2x32xf32>
    %124 = vector.extract_strided_slice %109 {offsets = [0, 96], sizes = [2, 32], strides = [1, 1]} : vector<2x128xf32> to vector<2x32xf32>
    %125 = arith.negf %124 : vector<2x32xf32>
    %126 = math.exp %125 : vector<2x32xf32>
    %cst_33 = arith.constant 1.000000e+00 : f32
    %127 = vector.broadcast %cst_33 : f32 to vector<2x32xf32>
    %128 = arith.addf %127, %126 : vector<2x32xf32>
    %129 = arith.divf %127, %128 : vector<2x32xf32>
    %130 = arith.mulf %121, %100 : vector<2x32xf32>
    %131 = arith.mulf %115, %123 : vector<2x32xf32>
    %132 = arith.addf %130, %131 : vector<2x32xf32>
    %133 = math.tanh %132 : vector<2x32xf32>
    %134 = arith.mulf %129, %133 : vector<2x32xf32>
    %135 = vector.extract_strided_slice %134 {offsets = [0, 0], sizes = [2, 16], strides = [1, 1]} : vector<2x32xf32> to vector<2x16xf32>
    %c6 = arith.constant 6 : index
    %c0_34 = arith.constant 0 : index
    %136 = vector.load %arg14[%c6, %c0_34] : memref<20x32xf32, #tpu.memory_space<vmem>>, vector<2x16xf32>
    tpu.vector_store %arg14[%c6, %c0_34], %135 {strides = array<i32>} : memref<20x32xf32, #tpu.memory_space<vmem>>, vector<2x16xf32>,
    %137 = vector.extract_strided_slice %134 {offsets = [0, 16], sizes = [2, 16], strides = [1, 1]} : vector<2x32xf32> to vector<2x16xf32>
    %c8 = arith.constant 8 : index
    %c16_35 = arith.constant 16 : index
    %138 = vector.load %arg14[%c8, %c16_35] : memref<20x32xf32, #tpu.memory_space<vmem>>, vector<2x16xf32>
    tpu.vector_store %arg14[%c8, %c16_35], %137 {strides = array<i32>} : memref<20x32xf32, #tpu.memory_space<vmem>>, vector<2x16xf32>,
    %139 = vector.extract_strided_slice %5 {offsets = [8, 0], sizes = [2, 128], strides = [1, 1]} : vector<16x128xf32> to vector<2x128xf32>
    %cst_36 = arith.constant dense<0.000000e+00> : vector<2x128xf32>
    %140 = tpu.matmul %134, %6, %cst_36 {dimension_numbers = #tpu.dot_dimension_numbers<[1], [0], [0], [1], [0, 0, 1, 1], [], []>} : vector<2x32xf32>, vector<32x128xf32>, vector<2x128xf32> -> vector<2x128xf32>
    %141 = arith.addf %139, %140 : vector<2x128xf32>
    %142 = vector.extract_strided_slice %141 {offsets = [0, 0], sizes = [2, 32], strides = [1, 1]} : vector<2x128xf32> to vector<2x32xf32>
    %143 = arith.negf %142 : vector<2x32xf32>
    %144 = math.exp %143 : vector<2x32xf32>
    %cst_37 = arith.constant 1.000000e+00 : f32
    %145 = vector.broadcast %cst_37 : f32 to vector<2x32xf32>
    %146 = arith.addf %145, %144 : vector<2x32xf32>
    %147 = arith.divf %145, %146 : vector<2x32xf32>
    %148 = vector.extract_strided_slice %141 {offsets = [0, 32], sizes = [2, 32], strides = [1, 1]} : vector<2x128xf32> to vector<2x32xf32>
    %149 = arith.negf %148 : vector<2x32xf32>
    %150 = math.exp %149 : vector<2x32xf32>
    %cst_38 = arith.constant 1.000000e+00 : f32
    %151 = vector.broadcast %cst_38 : f32 to vector<2x32xf32>
    %152 = arith.addf %151, %150 : vector<2x32xf32>
    %153 = arith.divf %151, %152 : vector<2x32xf32>
    %154 = vector.extract_strided_slice %141 {offsets = [0, 64], sizes = [2, 32], strides = [1, 1]} : vector<2x128xf32> to vector<2x32xf32>
    %155 = math.tanh %154 : vector<2x32xf32>
    %156 = vector.extract_strided_slice %141 {offsets = [0, 96], sizes = [2, 32], strides = [1, 1]} : vector<2x128xf32> to vector<2x32xf32>
    %157 = arith.negf %156 : vector<2x32xf32>
    %158 = math.exp %157 : vector<2x32xf32>
    %cst_39 = arith.constant 1.000000e+00 : f32
    %159 = vector.broadcast %cst_39 : f32 to vector<2x32xf32>
    %160 = arith.addf %159, %158 : vector<2x32xf32>
    %161 = arith.divf %159, %160 : vector<2x32xf32>
    %162 = arith.mulf %153, %132 : vector<2x32xf32>
    %163 = arith.mulf %147, %155 : vector<2x32xf32>
    %164 = arith.addf %162, %163 : vector<2x32xf32>
    %165 = math.tanh %164 : vector<2x32xf32>
    %166 = arith.mulf %161, %165 : vector<2x32xf32>
    %167 = vector.extract_strided_slice %166 {offsets = [0, 0], sizes = [2, 16], strides = [1, 1]} : vector<2x32xf32> to vector<2x16xf32>
    %c8_40 = arith.constant 8 : index
    %c0_41 = arith.constant 0 : index
    %168 = vector.load %arg14[%c8_40, %c0_41] : memref<20x32xf32, #tpu.memory_space<vmem>>, vector<2x16xf32>
    tpu.vector_store %arg14[%c8_40, %c0_41], %167 {strides = array<i32>} : memref<20x32xf32, #tpu.memory_space<vmem>>, vector<2x16xf32>,
    %169 = vector.extract_strided_slice %166 {offsets = [0, 16], sizes = [2, 16], strides = [1, 1]} : vector<2x32xf32> to vector<2x16xf32>
    %c6_42 = arith.constant 6 : index
    %c16_43 = arith.constant 16 : index
    %170 = vector.load %arg14[%c6_42, %c16_43] : memref<20x32xf32, #tpu.memory_space<vmem>>, vector<2x16xf32>
    tpu.vector_store %arg14[%c6_42, %c16_43], %169 {strides = array<i32>} : memref<20x32xf32, #tpu.memory_space<vmem>>, vector<2x16xf32>,
    %171 = vector.extract_strided_slice %5 {offsets = [10, 0], sizes = [2, 128], strides = [1, 1]} : vector<16x128xf32> to vector<2x128xf32>
    %cst_44 = arith.constant dense<0.000000e+00> : vector<2x128xf32>
    %172 = tpu.matmul %166, %6, %cst_44 {dimension_numbers = #tpu.dot_dimension_numbers<[1], [0], [0], [1], [0, 0, 1, 1], [], []>} : vector<2x32xf32>, vector<32x128xf32>, vector<2x128xf32> -> vector<2x128xf32>
    %173 = arith.addf %171, %172 : vector<2x128xf32>
    %174 = vector.extract_strided_slice %173 {offsets = [0, 0], sizes = [2, 32], strides = [1, 1]} : vector<2x128xf32> to vector<2x32xf32>
    %175 = arith.negf %174 : vector<2x32xf32>
    %176 = math.exp %175 : vector<2x32xf32>
    %cst_45 = arith.constant 1.000000e+00 : f32
    %177 = vector.broadcast %cst_45 : f32 to vector<2x32xf32>
    %178 = arith.addf %177, %176 : vector<2x32xf32>
    %179 = arith.divf %177, %178 : vector<2x32xf32>
    %180 = vector.extract_strided_slice %173 {offsets = [0, 32], sizes = [2, 32], strides = [1, 1]} : vector<2x128xf32> to vector<2x32xf32>
    %181 = arith.negf %180 : vector<2x32xf32>
    %182 = math.exp %181 : vector<2x32xf32>
    %cst_46 = arith.constant 1.000000e+00 : f32
    %183 = vector.broadcast %cst_46 : f32 to vector<2x32xf32>
    %184 = arith.addf %183, %182 : vector<2x32xf32>
    %185 = arith.divf %183, %184 : vector<2x32xf32>
    %186 = vector.extract_strided_slice %173 {offsets = [0, 64], sizes = [2, 32], strides = [1, 1]} : vector<2x128xf32> to vector<2x32xf32>
    %187 = math.tanh %186 : vector<2x32xf32>
    %188 = vector.extract_strided_slice %173 {offsets = [0, 96], sizes = [2, 32], strides = [1, 1]} : vector<2x128xf32> to vector<2x32xf32>
    %189 = arith.negf %188 : vector<2x32xf32>
    %190 = math.exp %189 : vector<2x32xf32>
    %cst_47 = arith.constant 1.000000e+00 : f32
    %191 = vector.broadcast %cst_47 : f32 to vector<2x32xf32>
    %192 = arith.addf %191, %190 : vector<2x32xf32>
    %193 = arith.divf %191, %192 : vector<2x32xf32>
    %194 = arith.mulf %185, %164 : vector<2x32xf32>
    %195 = arith.mulf %179, %187 : vector<2x32xf32>
    %196 = arith.addf %194, %195 : vector<2x32xf32>
    %197 = math.tanh %196 : vector<2x32xf32>
    %198 = arith.mulf %193, %197 : vector<2x32xf32>
    %199 = vector.extract_strided_slice %198 {offsets = [0, 0], sizes = [2, 16], strides = [1, 1]} : vector<2x32xf32> to vector<2x16xf32>
    %c10_48 = arith.constant 10 : index
    %c0_49 = arith.constant 0 : index
    %200 = vector.load %arg14[%c10_48, %c0_49] : memref<20x32xf32, #tpu.memory_space<vmem>>, vector<2x16xf32>
    tpu.vector_store %arg14[%c10_48, %c0_49], %199 {strides = array<i32>} : memref<20x32xf32, #tpu.memory_space<vmem>>, vector<2x16xf32>,
    %201 = vector.extract_strided_slice %198 {offsets = [0, 16], sizes = [2, 16], strides = [1, 1]} : vector<2x32xf32> to vector<2x16xf32>
    %c4_50 = arith.constant 4 : index
    %c16_51 = arith.constant 16 : index
    %202 = vector.load %arg14[%c4_50, %c16_51] : memref<20x32xf32, #tpu.memory_space<vmem>>, vector<2x16xf32>
    tpu.vector_store %arg14[%c4_50, %c16_51], %201 {strides = array<i32>} : memref<20x32xf32, #tpu.memory_space<vmem>>, vector<2x16xf32>,
    %203 = vector.extract_strided_slice %5 {offsets = [12, 0], sizes = [2, 128], strides = [1, 1]} : vector<16x128xf32> to vector<2x128xf32>
    %cst_52 = arith.constant dense<0.000000e+00> : vector<2x128xf32>
    %204 = tpu.matmul %198, %6, %cst_52 {dimension_numbers = #tpu.dot_dimension_numbers<[1], [0], [0], [1], [0, 0, 1, 1], [], []>} : vector<2x32xf32>, vector<32x128xf32>, vector<2x128xf32> -> vector<2x128xf32>
    %205 = arith.addf %203, %204 : vector<2x128xf32>
    %206 = vector.extract_strided_slice %205 {offsets = [0, 0], sizes = [2, 32], strides = [1, 1]} : vector<2x128xf32> to vector<2x32xf32>
    %207 = arith.negf %206 : vector<2x32xf32>
    %208 = math.exp %207 : vector<2x32xf32>
    %cst_53 = arith.constant 1.000000e+00 : f32
    %209 = vector.broadcast %cst_53 : f32 to vector<2x32xf32>
    %210 = arith.addf %209, %208 : vector<2x32xf32>
    %211 = arith.divf %209, %210 : vector<2x32xf32>
    %212 = vector.extract_strided_slice %205 {offsets = [0, 32], sizes = [2, 32], strides = [1, 1]} : vector<2x128xf32> to vector<2x32xf32>
    %213 = arith.negf %212 : vector<2x32xf32>
    %214 = math.exp %213 : vector<2x32xf32>
    %cst_54 = arith.constant 1.000000e+00 : f32
    %215 = vector.broadcast %cst_54 : f32 to vector<2x32xf32>
    %216 = arith.addf %215, %214 : vector<2x32xf32>
    %217 = arith.divf %215, %216 : vector<2x32xf32>
    %218 = vector.extract_strided_slice %205 {offsets = [0, 64], sizes = [2, 32], strides = [1, 1]} : vector<2x128xf32> to vector<2x32xf32>
    %219 = math.tanh %218 : vector<2x32xf32>
    %220 = vector.extract_strided_slice %205 {offsets = [0, 96], sizes = [2, 32], strides = [1, 1]} : vector<2x128xf32> to vector<2x32xf32>
    %221 = arith.negf %220 : vector<2x32xf32>
    %222 = math.exp %221 : vector<2x32xf32>
    %cst_55 = arith.constant 1.000000e+00 : f32
    %223 = vector.broadcast %cst_55 : f32 to vector<2x32xf32>
    %224 = arith.addf %223, %222 : vector<2x32xf32>
    %225 = arith.divf %223, %224 : vector<2x32xf32>
    %226 = arith.mulf %217, %196 : vector<2x32xf32>
    %227 = arith.mulf %211, %219 : vector<2x32xf32>
    %228 = arith.addf %226, %227 : vector<2x32xf32>
    %229 = math.tanh %228 : vector<2x32xf32>
    %230 = arith.mulf %225, %229 : vector<2x32xf32>
    %231 = vector.extract_strided_slice %230 {offsets = [0, 0], sizes = [2, 16], strides = [1, 1]} : vector<2x32xf32> to vector<2x16xf32>
    %c12_56 = arith.constant 12 : index
    %c0_57 = arith.constant 0 : index
    %232 = vector.load %arg14[%c12_56, %c0_57] : memref<20x32xf32, #tpu.memory_space<vmem>>, vector<2x16xf32>
    tpu.vector_store %arg14[%c12_56, %c0_57], %231 {strides = array<i32>} : memref<20x32xf32, #tpu.memory_space<vmem>>, vector<2x16xf32>,
    %233 = vector.extract_strided_slice %230 {offsets = [0, 16], sizes = [2, 16], strides = [1, 1]} : vector<2x32xf32> to vector<2x16xf32>
    %c2_58 = arith.constant 2 : index
    %c16_59 = arith.constant 16 : index
    %234 = vector.load %arg14[%c2_58, %c16_59] : memref<20x32xf32, #tpu.memory_space<vmem>>, vector<2x16xf32>
    tpu.vector_store %arg14[%c2_58, %c16_59], %233 {strides = array<i32>} : memref<20x32xf32, #tpu.memory_space<vmem>>, vector<2x16xf32>,
    %235 = vector.extract_strided_slice %5 {offsets = [14, 0], sizes = [2, 128], strides = [1, 1]} : vector<16x128xf32> to vector<2x128xf32>
    %cst_60 = arith.constant dense<0.000000e+00> : vector<2x128xf32>
    %236 = tpu.matmul %230, %6, %cst_60 {dimension_numbers = #tpu.dot_dimension_numbers<[1], [0], [0], [1], [0, 0, 1, 1], [], []>} : vector<2x32xf32>, vector<32x128xf32>, vector<2x128xf32> -> vector<2x128xf32>
    %237 = arith.addf %235, %236 : vector<2x128xf32>
    %238 = vector.extract_strided_slice %237 {offsets = [0, 0], sizes = [2, 32], strides = [1, 1]} : vector<2x128xf32> to vector<2x32xf32>
    %239 = arith.negf %238 : vector<2x32xf32>
    %240 = math.exp %239 : vector<2x32xf32>
    %cst_61 = arith.constant 1.000000e+00 : f32
    %241 = vector.broadcast %cst_61 : f32 to vector<2x32xf32>
    %242 = arith.addf %241, %240 : vector<2x32xf32>
    %243 = arith.divf %241, %242 : vector<2x32xf32>
    %244 = vector.extract_strided_slice %237 {offsets = [0, 32], sizes = [2, 32], strides = [1, 1]} : vector<2x128xf32> to vector<2x32xf32>
    %245 = arith.negf %244 : vector<2x32xf32>
    %246 = math.exp %245 : vector<2x32xf32>
    %cst_62 = arith.constant 1.000000e+00 : f32
    %247 = vector.broadcast %cst_62 : f32 to vector<2x32xf32>
    %248 = arith.addf %247, %246 : vector<2x32xf32>
    %249 = arith.divf %247, %248 : vector<2x32xf32>
    %250 = vector.extract_strided_slice %237 {offsets = [0, 64], sizes = [2, 32], strides = [1, 1]} : vector<2x128xf32> to vector<2x32xf32>
    %251 = math.tanh %250 : vector<2x32xf32>
    %252 = vector.extract_strided_slice %237 {offsets = [0, 96], sizes = [2, 32], strides = [1, 1]} : vector<2x128xf32> to vector<2x32xf32>
    %253 = arith.negf %252 : vector<2x32xf32>
    %254 = math.exp %253 : vector<2x32xf32>
    %cst_63 = arith.constant 1.000000e+00 : f32
    %255 = vector.broadcast %cst_63 : f32 to vector<2x32xf32>
    %256 = arith.addf %255, %254 : vector<2x32xf32>
    %257 = arith.divf %255, %256 : vector<2x32xf32>
    %258 = arith.mulf %249, %228 : vector<2x32xf32>
    %259 = arith.mulf %243, %251 : vector<2x32xf32>
    %260 = arith.addf %258, %259 : vector<2x32xf32>
    %261 = math.tanh %260 : vector<2x32xf32>
    %262 = arith.mulf %257, %261 : vector<2x32xf32>
    %263 = vector.extract_strided_slice %262 {offsets = [0, 0], sizes = [2, 16], strides = [1, 1]} : vector<2x32xf32> to vector<2x16xf32>
    %c14_64 = arith.constant 14 : index
    %c0_65 = arith.constant 0 : index
    %264 = vector.load %arg14[%c14_64, %c0_65] : memref<20x32xf32, #tpu.memory_space<vmem>>, vector<2x16xf32>
    tpu.vector_store %arg14[%c14_64, %c0_65], %263 {strides = array<i32>} : memref<20x32xf32, #tpu.memory_space<vmem>>, vector<2x16xf32>,
    %265 = vector.extract_strided_slice %262 {offsets = [0, 16], sizes = [2, 16], strides = [1, 1]} : vector<2x32xf32> to vector<2x16xf32>
    %c0_66 = arith.constant 0 : index
    %c16_67 = arith.constant 16 : index
    %266 = vector.load %arg14[%c0_66, %c16_67] : memref<20x32xf32, #tpu.memory_space<vmem>>, vector<2x16xf32>
    tpu.vector_store %arg14[%c0_66, %c16_67], %265 {strides = array<i32>} : memref<20x32xf32, #tpu.memory_space<vmem>>, vector<2x16xf32>,
    %c0_68 = arith.constant 0 : index
    %c0_69 = arith.constant 0 : index
    %267 = vector.load %arg14[%c0_68, %c0_69] : memref<20x32xf32, #tpu.memory_space<vmem>>, vector<14x32xf32>
    %c2_70 = arith.constant 2 : index
    %c0_71 = arith.constant 0 : index
    %268 = vector.load %arg14[%c2_70, %c0_71] : memref<20x32xf32, #tpu.memory_space<vmem>>, vector<14x32xf32>
    %c4_72 = arith.constant 4 : index
    %c0_73 = arith.constant 0 : index
    %269 = vector.load %arg14[%c4_72, %c0_73] : memref<20x32xf32, #tpu.memory_space<vmem>>, vector<14x32xf32>
    %c6_74 = arith.constant 6 : index
    %c0_75 = arith.constant 0 : index
    %270 = vector.load %arg14[%c6_74, %c0_75] : memref<20x32xf32, #tpu.memory_space<vmem>>, vector<14x32xf32>
    %271 = tpu.concatenate %267, %268, %269, %270 in 1 : vector<14x32xf32>, vector<14x32xf32>, vector<14x32xf32>, vector<14x32xf32> -> vector<14x128xf32>
    %c0_76 = arith.constant 0 : index
    %c0_77 = arith.constant 0 : index
    %272 = vector.load %arg4[%c0_76, %c0_77] : memref<128x24xf32, #tpu.memory_space<vmem>>, vector<128x24xf32>
    %cst_78 = arith.constant dense<0.000000e+00> : vector<14x24xf32>
    %273 = tpu.matmul %271, %272, %cst_78 {dimension_numbers = #tpu.dot_dimension_numbers<[1], [0], [0], [1], [0, 0, 1, 1], [], []>} : vector<14x128xf32>, vector<128x24xf32>, vector<14x24xf32> -> vector<14x24xf32>
    %c0_79 = arith.constant 0 : index
    %c0_80 = arith.constant 0 : index
    %274 = vector.load %arg5[%c0_79, %c0_80] : memref<1x24xf32, #tpu.memory_space<vmem>>, vector<1x24xf32>
    %275 = vector.broadcast %274 : vector<1x24xf32> to vector<14x24xf32>
    %276 = arith.addf %273, %275 : vector<14x24xf32>
    %cst_81 = arith.constant 0.000000e+00 : f32
    %277 = vector.broadcast %cst_81 : f32 to vector<14x24xf32>
    %278 = arith.maximumf %276, %277 : vector<14x24xf32>
    %c0_82 = arith.constant 0 : index
    %c0_83 = arith.constant 0 : index
    %279 = vector.load %arg6[%c0_82, %c0_83] : memref<14x24xf32, #tpu.memory_space<vmem>>, vector<14x24xf32>
    %280 = arith.addf %278, %279 : vector<14x24xf32>
    %281 = vector.extract_strided_slice %280 {offsets = [0, 0], sizes = [2, 24], strides = [1, 1]} : vector<14x24xf32> to vector<2x24xf32>
    %282 = vector.extract_strided_slice %280 {offsets = [2, 0], sizes = [2, 24], strides = [1, 1]} : vector<14x24xf32> to vector<2x24xf32>
    %283 = arith.maximumf %281, %282 : vector<2x24xf32>
    %284 = vector.extract_strided_slice %280 {offsets = [4, 0], sizes = [2, 24], strides = [1, 1]} : vector<14x24xf32> to vector<2x24xf32>
    %285 = arith.maximumf %283, %284 : vector<2x24xf32>
    %286 = vector.extract_strided_slice %280 {offsets = [6, 0], sizes = [2, 24], strides = [1, 1]} : vector<14x24xf32> to vector<2x24xf32>
    %287 = arith.maximumf %285, %286 : vector<2x24xf32>
    %288 = vector.extract_strided_slice %280 {offsets = [8, 0], sizes = [2, 24], strides = [1, 1]} : vector<14x24xf32> to vector<2x24xf32>
    %289 = arith.maximumf %287, %288 : vector<2x24xf32>
    %290 = vector.extract_strided_slice %280 {offsets = [10, 0], sizes = [2, 24], strides = [1, 1]} : vector<14x24xf32> to vector<2x24xf32>
    %291 = arith.maximumf %289, %290 : vector<2x24xf32>
    %292 = vector.extract_strided_slice %280 {offsets = [12, 0], sizes = [2, 24], strides = [1, 1]} : vector<14x24xf32> to vector<2x24xf32>
    %293 = arith.maximumf %291, %292 : vector<2x24xf32>
    %c0_84 = arith.constant 0 : index
    %c0_85 = arith.constant 0 : index
    %294 = vector.load %arg7[%c0_84, %c0_85] : memref<24x16xf32, #tpu.memory_space<vmem>>, vector<24x16xf32>
    %cst_86 = arith.constant dense<0.000000e+00> : vector<2x16xf32>
    %295 = tpu.matmul %293, %294, %cst_86 {dimension_numbers = #tpu.dot_dimension_numbers<[1], [0], [0], [1], [0, 0, 1, 1], [], []>} : vector<2x24xf32>, vector<24x16xf32>, vector<2x16xf32> -> vector<2x16xf32>
    %c0_87 = arith.constant 0 : index
    %c0_88 = arith.constant 0 : index
    %296 = vector.load %arg8[%c0_87, %c0_88] : memref<1x16xf32, #tpu.memory_space<vmem>>, vector<1x16xf32>
    %297 = vector.broadcast %296 : vector<1x16xf32> to vector<2x16xf32>
    %298 = arith.addf %295, %297 : vector<2x16xf32>
    %299 = math.tanh %298 : vector<2x16xf32>
    %c0_89 = arith.constant 0 : index
    %c0_90 = arith.constant 0 : index
    %300 = vector.load %arg11[%c0_89, %c0_90] : memref<2x1xf32, #tpu.memory_space<vmem>>, vector<2x1xf32>
    %c0_91 = arith.constant 0 : index
    %c0_92 = arith.constant 0 : index
    %301 = memref.load %arg12[%c0_91, %c0_92] : memref<1x1xf32, #tpu.memory_space<smem>>
    %cst_93 = arith.constant 0.000000e+00 : f32
    %302 = arith.subf %cst_93, %301 : f32
    %cst_94 = arith.constant 3.000000e+01 : f32
    %303 = arith.divf %302, %cst_94 : f32
    %304 = vector.broadcast %303 : f32 to vector<2x1xf32>
    %305 = arith.mulf %300, %304 : vector<2x1xf32>
    %306 = math.exp %305 : vector<2x1xf32>
    %307 = vector.broadcast %306 : vector<2x1xf32> to vector<2x16xf32>
    %308 = arith.mulf %299, %307 : vector<2x16xf32>
    %c0_95 = arith.constant 0 : index
    %c0_96 = arith.constant 0 : index
    %309 = vector.load %arg9[%c0_95, %c0_96] : memref<16x16xf32, #tpu.memory_space<vmem>>, vector<16x16xf32>
    %cst_97 = arith.constant dense<0.000000e+00> : vector<2x16xf32>
    %310 = tpu.matmul %308, %309, %cst_97 {dimension_numbers = #tpu.dot_dimension_numbers<[1], [0], [0], [1], [0, 0, 1, 1], [], []>} : vector<2x16xf32>, vector<16x16xf32>, vector<2x16xf32> -> vector<2x16xf32>
    %c0_98 = arith.constant 0 : index
    %c0_99 = arith.constant 0 : index
    %311 = vector.load %arg10[%c0_98, %c0_99] : memref<1x16xf32, #tpu.memory_space<vmem>>, vector<1x16xf32>
    %312 = vector.broadcast %311 : vector<1x16xf32> to vector<2x16xf32>
    %313 = arith.addf %310, %312 : vector<2x16xf32>
    %314 = math.tanh %313 : vector<2x16xf32>
    %c0_100 = arith.constant 0 : index
    %c0_101 = arith.constant 0 : index
    %315 = vector.load %arg13[%c0_100, %c0_101] : memref<2x16xf32, #tpu.memory_space<vmem>>, vector<2x16xf32>
    tpu.vector_store %arg13[%c0_100, %c0_101], %314 {strides = array<i32>} : memref<2x16xf32, #tpu.memory_space<vmem>>, vector<2x16xf32>,
    return
  }
}

</mosaic_0001>

<bundles_post_ra>
// kernel: cnn_layer_forward.1
= control target key start
LH: loop header
LB: loop body
LE: loop exit
PB: predicated region body
PF: predicated region fallthrough
CT: control target
= control target key end

     0   :  { %v1842_v3 = vmov 0.0|0.0   ;;  %vm1843_vm0 = vmmov 0   ;;  %v1844_v4 = vmov 0.0   ;;  %vm62_vm1 = vcmask 523264   ;;  %s1845_s18 = smov 64   ;;  %s2218_s1 = inlined_call_operand.vmem [shape: f32[64,128], index: 1, kind: input, shape index: {}]   ;;  %s2219_s2 = inlined_call_operand.vmem [shape: f32[32,128], index: 2, kind: input, shape index: {}]   ;;  %s2220_s0 = inlined_call_operand.vmem [shape: f32[16,64], index: 0, kind: input, shape index: {}]   ;;  %s2221_s3 = inlined_call_operand.vmem [shape: f32[1,128], index: 3, kind: input, shape index: {}]   ;;  %s2222_s4 = inlined_call_operand.vmem [shape: f32[128,24], index: 4, kind: input, shape index: {}]   ;;  %s2223_s7 = inlined_call_operand.vmem [shape: f32[24,16], index: 7, kind: input, shape index: {}]   ;;  %s2224_s11 = inlined_call_operand.vmem [shape: f32[2,1], index: 11, kind: input, shape index: {}]   ;;  %s2225_s12 = inlined_call_operand.<no memory space> [shape: f32[1,1], index: 12, kind: input, shape index: {}]   ;;  %s2226_s5 = inlined_call_operand.vmem [shape: f32[1,24], index: 5, kind: input, shape index: {}]   ;;  %s2227_s6 = inlined_call_operand.vmem [shape: f32[14,24], index: 6, kind: input, shape index: {}]   ;;  %s2228_s9 = inlined_call_operand.vmem [shape: f32[16,16], index: 9, kind: input, shape index: {}]   ;;  %s2229_s8 = inlined_call_operand.vmem [shape: f32[1,16], index: 8, kind: input, shape index: {}]   ;;  %s2230_s10 = inlined_call_operand.vmem [shape: f32[1,16], index: 10, kind: input, shape index: {}]   ;;  %s2231_s13 = inlined_call_operand.vmem [shape: f32[2,16], index: 13, kind: output, shape index: {}]  }
   0x1   :  { %v47_v0 = vld [vmem:[%s2218_s1] sm:$0xff]  ;;  %v48_v1 = vld [vmem:[%s2218_s1 + $0x8] sm:$0xff]  ;;  %v49_v2 = vld [vmem:[%s2218_s1 + $0x10] sm:$0xff]  ;;  %1663 = vmatprep.subr.bf16.mxu1 %v1842_v3  ;;  %1516 = vmatprep.mubr.msk.f32.mxu1 %vm1843_vm0, %v1844_v4  ;;  %vm148_vm2 = vcmask 261120   ;;  %vm255_vm3 = vcmask 123904   ;;  %vm257_vm4 = vcmask 255104  }
   0x2   :  { %v1647_v5 = vpack.c.bf16 %v48_v1, %v47_v0  ;;  %v50_v6 = vld [vmem:[%s2218_s1 + $0x18] sm:$0xff]  ;;  %v51_v7 = vld [vmem:[%s2218_s1 + $0x20] sm:$0xff]  ;;  %v52_v9 = vld [vmem:[%s2218_s1 + $0x28] sm:$0xff]  ;;  %149 = vst.msk [vmem:[#allocation2] sm:$0xff] %vm148_vm2, %v1844_v4  ;;  %vm366_vm5 = vcmask 125954   ;;  %vm368_vm6 = vcmask 257154  }
   0x3   :  { %v1651_v8 = vpack.c.bf16 %v50_v6, %v49_v2  ;;  %v144_v10 = vld [vmem:[%s2219_s2] sm:$0xff]  ;;  %v145_v11 = vld [vmem:[%s2219_s2 + $0x8] sm:$0xff]  ;;  %v146_v14 = vld [vmem:[%s2219_s2 + $0x10] sm:$0xff]  ;;  %v1655_v16 = vpack.c.bf16 %v52_v9, %v51_v7  ;;  %150 = vst.msk [vmem:[#allocation2 + $0x8] sm:$0xff] %vm148_vm2, %v1844_v4  ;;  %vm594_vm7 = vcmask 130054   ;;  %vm596_vm8 = vcmask 261254  }
   0x4   :  { %1648 = vmatprep.subr.bf16.mxu0 %v1647_v5  ;;  %v1946_v12 = vpack.c.bf16 %v145_v11, %v144_v10  ;;  %v45_v13 = vld [vmem:[%s2220_s0] sm:$0xff]  ;;  %v147_v15 = vld [vmem:[%s2219_s2 + $0x18] sm:$0xff]  ;;  %v53_v18 = vld [vmem:[%s2218_s1 + $0x30] sm:$0xff]  ;;  %vm480_vm9 = vcmask 128004   ;;  %vm482_vm10 = vcmask 259204   ;;  %vm151_vm11 = vcmask 257024  }
   0x5   :  { %1650 = vmatpush3.bf16.msra.mxu0 %v1647_v5  ;;  %1505 = vmatprep.mubr.msk.f32.mxu0 %vm62_vm1, %v45_v13  ;;  %v1959_v17 = vpack.c.bf16 %v147_v15, %v146_v14  ;;  %v54_v19 = vld [vmem:[%s2218_s1 + $0x38] sm:$0xff]  ;;  %v46_v21 = vld [vmem:[%s2220_s0 + $0x8] sm:$0xff]  ;;  %v1391_v24 = vld [vmem:[%s2221_s3] ss:$0 sm:$0xff]  ;;  %s1846_s3 = smov 32   ;;  %vm1076_vm12 = vcmask 785408  }
   0x6   :  { %1652 = vmatprep.subr.bf16.mxu0 %v1651_v8  ;;  %1665 = vmatpush3.bf16.msra.mxu1 %v1946_v12  ;;  %v1659_v20 = vpack.c.bf16 %v54_v19, %v53_v18  ;;  %152 = vst.msk [vmem:[#allocation2 + $0x10] sm:$0xf] %vm151_vm11, %v1844_v4  ;;  %s1288_s19 = ssub.f32 0.0, %s2225_s12  ;;  %vm1211_vm13 = vcmask 195584   ;;  %vm1311_vm14 = vcmask 130048  }
   0x7   :  { %1666 = vmatprep.subr.bf16.mxu1 %v1842_v3 }
   0x8   :  { %s1291_s22 = smul.f32 0.033333335, %s1288_s19 }
   0x9   :  { %1654 = vmatpush3.bf16.msra.mxu0 %v1651_v8 }
   0xa   :  { %1656 = vmatprep.subr.bf16.mxu0 %v1655_v16  ;;  %1668 = vmatpush3.bf16.msra.mxu1 %v1959_v17 }
   0xb   :  { %1669 = vmatprep.subr.bf16.mxu1 %v1842_v3 }
   0xd   :  { %1658 = vmatpush3.bf16.msra.mxu0 %v1655_v16  ;;  %1517 = vmatmul.mubr.f32.vlgmr.msra.gmra.mrb[0].mxu1 %v1844_v4 }
   0xe   :  { %1660 = vmatprep.subr.bf16.mxu0 %v1659_v20  ;;  %1671 = vmatpush3.bf16.msra.mxu1 %v1946_v12 }
   0xf   :  { %1672 = vmatprep.subr.bf16.mxu1 %v1842_v3  ;;  %1527 = vmatprep.mubr.msk.f32.mxu1 %vm1843_vm0, %v1844_v4 }
  0x11   :  { %1662 = vmatpush3.bf16.msra.mxu0 %v1659_v20 }
  0x12   :  { %1674 = vmatpush3.bf16.msra.mxu1 %v1959_v17  ;;  %1687 = vmatprep.subr.bf16.mxu0 %v1842_v3 }
  0x13   :  { %1675 = vmatprep.subr.bf16.mxu1 %v1842_v3 }
  0x14   :  { %1506 = vmatmul.mubr.msk.f32.vlgmr.msra.gmra.mrb[0].mxu0 %vm62_vm1, %v46_v21 }
  0x15   :  { %1689 = vmatpush3.bf16.msra.mxu0 %v1946_v12  ;;  %1560 = vmatprep.mubr.msk.f32.mxu0 %vm1843_vm0, %v1844_v4 }
  0x16   :  { %1690 = vmatprep.subr.bf16.mxu0 %v1842_v3 }
  0x19   :  { %1692 = vmatpush3.bf16.msra.mxu0 %v1959_v17 }
  0x1a   :  { %1699 = vmatprep.subr.bf16.mxu0 %v1842_v3 }
  0xe0   :  { %v222_v22 = vpop.f32.mrb[0].mxu1 }
  0xe1   :  { %v1518_v23 = vpop.f32.mrb[1].mxu1 }
  0xe7   :  { %v1507_v25 = vpop.f32.mrb[0].mxu0 }
  0xe8   :  { %v1991_v26 = vadd.f32 %v1507_v25, %v1391_v24  ;;  %v135_v27 = vpop.f32.mrb[1].mxu0 }
  0xe9   :  { %v1993_v28 = vadd.f32 %v1391_v24, %v135_v27 }
  0xeb   :  { %v226_v29 = vadd.f32 %v222_v22, %v1993_v28 }
  0xed   :  { %1772 = vtanh.f32 %v226_v29  ;;  %v1394_v31 = vmul.f32 -1.442695, %v226_v29 }
  0xef   :  { %1774 = vpow2.f32 %v1394_v31 }
  0xf7   :  { %v1773_v30 = vpop.eup %1772 }
  0xf8   :  { %236 = vrot.lane.b32.xlu0 %v1773_v30, %s1845_s18 }
  0xf9   :  { %v1775_v32 = vpop.eup %1774 }
  0xfa   :  { %v230_v33 = vadd.f32 1.0, %v1775_v32 }
  0xfc   :  { %1776 = vrcp.f32 %v230_v33 }
 0x106   :  { %v1777_v34 = vpop.eup %1776 }
 0x107   :  { %v234_v37 = vmul.f32 0.0, %v1777_v34 }
 0x16a   :  { %v237_v35 = vpop.permute.xlu0 %236 }
 0x16b   :  { %v239_v36 = vmul.f32 %v1777_v34, %v237_v35 }
 0x16d   :  { %241 = vrot.lane.b32.xlu0 %v239_v36, %s1846_s3 }
 0x1df   :  { %v242_v38 = vpop.permute.xlu0 %241 }
 0x1e0   :  { %v244_v39 = vadd.f32 %v242_v38, %v234_v37 }
 0x1e2   :  { %1778 = vtanh.f32 %v244_v39  ;;  %v343_v55 = vrot.slane %v244_v39, 6 }
 0x1ec   :  { %v1779_v40 = vpop.eup %1778 }
 0x1ed   :  { %247 = vrot.lane.b32.xlu1 %v1779_v40, %s1845_s18 }
 0x25f   :  { %v248_v41 = vpop.permute.xlu1 %247 }
 0x260   :  { %v250_v42 = vmul.f32 %v1777_v34, %v248_v41 }
 0x262   :  { %252 = vrot.lane.b32.xlu1 %v250_v42, %s1846_s3 }
 0x2d4   :  { %v253_v43 = vpop.permute.xlu1 %252 }
 0x2d5   :  { %256 = vst.msk [vmem:[#allocation2] sm:$0x3] %vm255_vm3, %v253_v43  ;;  %1528 = vmatmul.mubr.msk.f32.vlgmr.msra.gmra.mrb[2].mxu1 %vm148_vm2, %v253_v43 }
 0x2d6   :  { %258 = vst.msk [vmem:[#allocation2 + $0xe] sm:$0x3] %vm257_vm4, %v253_v43  ;;  %1677 = vmatpush3.bf16.msra.mxu1 %v1946_v12  ;;  %1538 = vmatprep.mubr.msk.f32.mxu1 %vm1843_vm0, %v1844_v4 }
 0x2d7   :  { %1678 = vmatprep.subr.bf16.mxu1 %v1842_v3 }
 0x2da   :  { %1680 = vmatpush3.bf16.msra.mxu1 %v1959_v17 }
 0x2db   :  { %1681 = vmatprep.subr.bf16.mxu1 %v1842_v3 }
 0x3a8   :  { %v327_v44 = vpop.f32.mrb[2].mxu1 }
 0x3a9   :  { %v332_v45 = vrot.slane %v327_v44, 6  ;;  %v1529_v46 = vpop.f32.mrb[3].mxu1 }
 0x3ab   :  { %v334_v47 = vadd.f32 %v332_v45, %v1993_v28 }
 0x3ad   :  { %1780 = vtanh.f32 %v334_v47  ;;  %v1396_v49 = vmul.f32 -1.442695, %v334_v47 }
 0x3af   :  { %1782 = vpow2.f32 %v1396_v49 }
 0x3b7   :  { %v1781_v48 = vpop.eup %1780 }
 0x3b8   :  { %347 = vrot.lane.b32.xlu0 %v1781_v48, %s1845_s18 }
 0x3b9   :  { %v1783_v50 = vpop.eup %1782 }
 0x3ba   :  { %v338_v51 = vadd.f32 1.0, %v1783_v50 }
 0x3bc   :  { %1784 = vrcp.f32 %v338_v51 }
 0x3c6   :  { %v1785_v52 = vpop.eup %1784 }
 0x3c7   :  { %v345_v56 = vmul.f32 %v1785_v52, %v343_v55 }
 0x42a   :  { %v348_v53 = vpop.permute.xlu0 %347 }
 0x42b   :  { %v350_v54 = vmul.f32 %v1785_v52, %v348_v53 }
 0x42d   :  { %352 = vrot.lane.b32.xlu1 %v350_v54, %s1846_s3 }
 0x49f   :  { %v353_v57 = vpop.permute.xlu1 %352 }
 0x4a0   :  { %v355_v58 = vadd.f32 %v353_v57, %v345_v56 }
 0x4a2   :  { %1786 = vtanh.f32 %v355_v58  ;;  %v457_v14 = vrot.slane %v355_v58, 6 }
 0x4ac   :  { %v1787_v59 = vpop.eup %1786 }
 0x4ad   :  { %358 = vrot.lane.b32.xlu0 %v1787_v59, %s1845_s18 }
 0x51f   :  { %v359_v60 = vpop.permute.xlu0 %358 }
 0x520   :  { %v2017_v61 = vmul.f32 %v1785_v52, %v359_v60 }
 0x522   :  { %v370_v62 = vrot.slane %v2017_v61, 2 }
 0x524   :  { %371 = vrot.lane.b32.xlu1 %v370_v62, %s1846_s3 }
 0x596   :  { %v372_v63 = vpop.permute.xlu1 %371 }
 0x597   :  { %1539 = vmatmul.mubr.msk.f32.vlgmr.msra.gmra.mrb[4].mxu1 %vm148_vm2, %v372_v63 }
 0x598   :  { %1683 = vmatpush3.bf16.msra.mxu1 %v1946_v12  ;;  %1549 = vmatprep.mubr.msk.f32.mxu1 %vm1843_vm0, %v1844_v4 }
 0x599   :  { %1684 = vmatprep.subr.bf16.mxu1 %v1842_v3 }
 0x59c   :  { %1686 = vmatpush3.bf16.msra.mxu1 %v1959_v17 }
 0x59d   :  { %1693 = vmatprep.subr.bf16.mxu1 %v1842_v3 }
 0x66a   :  { %v441_v0 = vpop.f32.mrb[4].mxu1 }
 0x66b   :  { %v446_v1 = vrot.slane %v441_v0, 4  ;;  %v1540_v2 = vpop.f32.mrb[5].mxu1 }
 0x66d   :  { %v448_v5 = vadd.f32 %v446_v1, %v1993_v28 }
 0x66f   :  { %1788 = vtanh.f32 %v448_v5  ;;  %v1398_v7 = vmul.f32 -1.442695, %v448_v5 }
 0x671   :  { %1790 = vpow2.f32 %v1398_v7 }
 0x679   :  { %v1789_v6 = vpop.eup %1788 }
 0x67a   :  { %461 = vrot.lane.b32.xlu0 %v1789_v6, %s1845_s18 }
 0x67b   :  { %v1791_v8 = vpop.eup %1790 }
 0x67c   :  { %v452_v9 = vadd.f32 1.0, %v1791_v8 }
 0x67e   :  { %1792 = vrcp.f32 %v452_v9 }
 0x688   :  { %v1793_v10 = vpop.eup %1792 }
 0x689   :  { %v459_v15 = vmul.f32 %v1793_v10, %v457_v14 }
 0x6ec   :  { %v462_v11 = vpop.permute.xlu0 %461 }
 0x6ed   :  { %v464_v13 = vmul.f32 %v1793_v10, %v462_v11 }
 0x6ef   :  { %466 = vrot.lane.b32.xlu1 %v464_v13, %s1846_s3 }
 0x761   :  { %v467_v16 = vpop.permute.xlu1 %466 }
 0x762   :  { %v469_v18 = vadd.f32 %v467_v16, %v459_v15 }
 0x764   :  { %1794 = vtanh.f32 %v469_v18  ;;  %v571_v37 = vrot.slane %v469_v18, 6 }
 0x76e   :  { %v1795_v19 = vpop.eup %1794 }
 0x76f   :  { %472 = vrot.lane.b32.xlu0 %v1795_v19, %s1845_s18 }
 0x7e1   :  { %v473_v20 = vpop.permute.xlu0 %472 }
 0x7e2   :  { %v2032_v21 = vmul.f32 %v1793_v10, %v473_v20 }
 0x7e4   :  { %v484_v22 = vrot.slane %v2032_v21, 4 }
 0x7e6   :  { %485 = vrot.lane.b32.xlu1 %v484_v22, %s1846_s3 }
 0x858   :  { %v486_v23 = vpop.permute.xlu1 %485 }
 0x859   :  { %1550 = vmatmul.mubr.msk.f32.vlgmr.msra.gmra.mrb[6].mxu1 %vm148_vm2, %v486_v23 }
 0x85a   :  { %1695 = vmatpush3.bf16.msra.mxu1 %v1946_v12  ;;  %1571 = vmatprep.mubr.msk.f32.mxu1 %vm1843_vm0, %v1844_v4 }
 0x85b   :  { %1696 = vmatprep.subr.bf16.mxu1 %v1842_v3 }
 0x85e   :  { %1698 = vmatpush3.bf16.msra.mxu1 %v1959_v17 }
 0x85f   :  { %1705 = vmatprep.subr.bf16.mxu1 %v1842_v3 }
 0x92c   :  { %v555_v24 = vpop.f32.mrb[6].mxu1 }
 0x92d   :  { %v560_v25 = vrot.slane %v555_v24, 2  ;;  %v1551_v27 = vpop.f32.mrb[7].mxu1 }
 0x92f   :  { %v562_v29 = vadd.f32 %v560_v25, %v1993_v28 }
 0x931   :  { %1796 = vtanh.f32 %v562_v29  ;;  %v1400_v31 = vmul.f32 -1.442695, %v562_v29 }
 0x933   :  { %1798 = vpow2.f32 %v1400_v31 }
 0x93b   :  { %v1797_v30 = vpop.eup %1796 }
 0x93c   :  { %575 = vrot.lane.b32.xlu0 %v1797_v30, %s1845_s18 }
 0x93d   :  { %v1799_v32 = vpop.eup %1798 }
 0x93e   :  { %v566_v33 = vadd.f32 1.0, %v1799_v32 }
 0x940   :  { %1800 = vrcp.f32 %v566_v33 }
 0x94a   :  { %v1801_v34 = vpop.eup %1800 }
 0x94b   :  { %v573_v38 = vmul.f32 %v1801_v34, %v571_v37 }
 0x9ae   :  { %v576_v35 = vpop.permute.xlu0 %575 }
 0x9af   :  { %v578_v36 = vmul.f32 %v1801_v34, %v576_v35 }
 0x9b1   :  { %580 = vrot.lane.b32.xlu1 %v578_v36, %s1846_s3 }
 0xa23   :  { %v581_v39 = vpop.permute.xlu1 %580 }
 0xa24   :  { %v583_v40 = vadd.f32 %v581_v39, %v573_v38 }
 0xa26   :  { %1802 = vtanh.f32 %v583_v40  ;;  %v682_v55 = vrot.slane %v583_v40, 6 }
 0xa30   :  { %v1803_v28 = vpop.eup %1802 }
 0xa31   :  { %586 = vrot.lane.b32.xlu0 %v1803_v28, %s1845_s18 }
 0xaa3   :  { %v587_v41 = vpop.permute.xlu0 %586 }
 0xaa4   :  { %v2047_v42 = vmul.f32 %v1801_v34, %v587_v41 }
 0xaa6   :  { %v598_v43 = vrot.slane %v2047_v42, 6 }
 0xaa8   :  { %599 = vrot.lane.b32.xlu1 %v598_v43, %s1846_s3 }
 0xb1a   :  { %v600_v44 = vpop.permute.xlu1 %599 }
 0xb1b   :  { %1561 = vmatmul.mubr.msk.f32.vlgmr.msra.gmra.mrb[2].mxu0 %vm148_vm2, %v600_v44 }
 0xb1c   :  { %1701 = vmatpush3.bf16.msra.mxu0 %v1946_v12  ;;  %1582 = vmatprep.mubr.msk.f32.mxu0 %vm1843_vm0, %v1844_v4 }
 0xb1d   :  { %1702 = vmatprep.subr.bf16.mxu0 %v1842_v3 }
 0xb20   :  { %1704 = vmatpush3.bf16.msra.mxu0 %v1959_v17 }
 0xbee   :  { %v669_v45 = vpop.f32.mrb[2].mxu0 }
 0xbef   :  { %v673_v46 = vadd.f32 %v669_v45, %v1991_v26  ;;  %v1562_v47 = vpop.f32.mrb[3].mxu0 }
 0xbf1   :  { %1804 = vtanh.f32 %v673_v46  ;;  %v1402_v49 = vmul.f32 -1.442695, %v673_v46 }
 0xbf3   :  { %1806 = vpow2.f32 %v1402_v49 }
 0xbfb   :  { %v1805_v48 = vpop.eup %1804 }
 0xbfc   :  { %686 = vrot.lane.b32.xlu0 %v1805_v48, %s1845_s18 }
 0xbfd   :  { %v1807_v50 = vpop.eup %1806 }
 0xbfe   :  { %v677_v51 = vadd.f32 1.0, %v1807_v50 }
 0xc00   :  { %1808 = vrcp.f32 %v677_v51 }
 0xc0a   :  { %v1809_v52 = vpop.eup %1808 }
 0xc0b   :  { %v684_v56 = vmul.f32 %v1809_v52, %v682_v55 }
 0xc6e   :  { %v687_v53 = vpop.permute.xlu0 %686 }
 0xc6f   :  { %v689_v54 = vmul.f32 %v1809_v52, %v687_v53 }
 0xc71   :  { %691 = vrot.lane.b32.xlu1 %v689_v54, %s1846_s3 }
 0xce3   :  { %v692_v57 = vpop.permute.xlu1 %691 }
 0xce4   :  { %v694_v58 = vadd.f32 %v692_v57, %v684_v56 }
 0xce6   :  { %1810 = vtanh.f32 %v694_v58 }
 0xcf0   :  { %v1811_v59 = vpop.eup %1810 }
 0xcf1   :  { %697 = vrot.lane.b32.xlu0 %v1811_v59, %s1845_s18 }
 0xd63   :  { %v698_v60 = vpop.permute.xlu0 %697 }
 0xd64   :  { %v700_v62 = vmul.f32 %v1809_v52, %v698_v60 }
 0xd66   :  { %702 = vrot.lane.b32.xlu1 %v700_v62, %s1846_s3 }
 0xdd8   :  { %v2062_v63 = vpop.permute.xlu1 %702 }
 0xdd9   :  { %1572 = vmatmul.mubr.msk.f32.vlgmr.msra.gmra.mrb[8].mxu1 %vm148_vm2, %v2062_v63 }
 0xdda   :  { %1707 = vmatpush3.bf16.msra.mxu1 %v1946_v12  ;;  %1593 = vmatprep.mubr.msk.f32.mxu1 %vm1843_vm0, %v1844_v4 }
 0xddb   :  { %1708 = vmatprep.subr.bf16.mxu1 %v1842_v3 }
 0xdde   :  { %1710 = vmatpush3.bf16.msra.mxu1 %v1959_v17  ;;  %v791_v17 = vrot.slane %v694_v58, 6 }
 0xddf   :  { %1743 = vmatprep.subr.bf16.mxu1 %v1842_v3 }
 0xeac   :  { %v775_v0 = vpop.f32.mrb[8].mxu1 }
 0xead   :  { %v780_v1 = vrot.slane %v775_v0, 6  ;;  %v1573_v2 = vpop.f32.mrb[9].mxu1 }
 0xeae   :  { %v1081_v2 = vld [vmem:[%s2222_s4 + $0x10] sm:$0xff] }
 0xeaf   :  { %v782_v5 = vadd.f32 %v780_v1, %v1991_v26  ;;  %v1079_v1 = vld [vmem:[%s2222_s4] sm:$0xff] }
 0xeb1   :  { %1812 = vtanh.f32 %v782_v5  ;;  %v1404_v7 = vmul.f32 -1.442695, %v782_v5 }
 0xeb3   :  { %1814 = vpow2.f32 %v1404_v7 }
 0xebb   :  { %v1813_v6 = vpop.eup %1812 }
 0xebc   :  { %795 = vrot.lane.b32.xlu0 %v1813_v6, %s1845_s18  ;;  %v1082_v6 = vld [vmem:[%s2222_s4 + $0x18] sm:$0xff] }
 0xebd   :  { %v1815_v12 = vpop.eup %1814  ;;  %v1715_v7 = vpack.c.bf16 %v1082_v6, %v1081_v2 }
 0xebe   :  { %v786_v8 = vadd.f32 1.0, %v1815_v12  ;;  %v1083_v12 = vld [vmem:[%s2222_s4 + $0x20] sm:$0xff] }
 0xec0   :  { %1816 = vrcp.f32 %v786_v8  ;;  %v1084_v8 = vld [vmem:[%s2222_s4 + $0x28] sm:$0xff] }
 0xeca   :  { %v1817_v9 = vpop.eup %1816 }
 0xecb   :  { %v793_v13 = vmul.f32 %v1817_v9, %v791_v17  ;;  %v1086_v17 = vld [vmem:[%s2222_s4 + $0x38] sm:$0xff] }
 0xf2e   :  { %v796_v10 = vpop.permute.xlu0 %795 }
 0xf2f   :  { %v798_v11 = vmul.f32 %v1817_v9, %v796_v10  ;;  %v1719_v10 = vpack.c.bf16 %v1084_v8, %v1083_v12 }
 0xf31   :  { %800 = vrot.lane.b32.xlu1 %v798_v11, %s1846_s3  ;;  %v1085_v11 = vld [vmem:[%s2222_s4 + $0x30] sm:$0xff] }
 0xfa3   :  { %v801_v14 = vpop.permute.xlu1 %800 }
 0xfa4   :  { %v803_v15 = vadd.f32 %v801_v14, %v793_v13  ;;  %v1723_v13 = vpack.c.bf16 %v1086_v17, %v1085_v11  ;;  %v1087_v14 = vld [vmem:[%s2222_s4 + $0x40] sm:$0xff] }
 0xfa6   :  { %1818 = vtanh.f32 %v803_v15  ;;  %v903_v36 = vrot.slane %v803_v15, 6  ;;  %v1088_v15 = vld [vmem:[%s2222_s4 + $0x48] sm:$0xff] }
 0xfb0   :  { %v1819_v16 = vpop.eup %1818 }
 0xfb1   :  { %806 = vrot.lane.b32.xlu0 %v1819_v16, %s1845_s18  ;;  %v1727_v16 = vpack.c.bf16 %v1088_v15, %v1087_v14 }
0x1023   :  { %v807_v18 = vpop.permute.xlu0 %806 }
0x1024   :  { %v2076_v19 = vmul.f32 %v1817_v9, %v807_v18  ;;  %v1089_v18 = vld [vmem:[%s2222_s4 + $0x50] sm:$0xff] }
0x1026   :  { %v816_v20 = vrot.slane %v2076_v19, 2 }
0x1028   :  { %817 = vrot.lane.b32.xlu1 %v816_v20, %s1846_s3 }
0x109a   :  { %v818_v22 = vpop.permute.xlu1 %817 }
0x109b   :  { %1583 = vmatmul.mubr.msk.f32.vlgmr.msra.gmra.mrb[4].mxu0 %vm148_vm2, %v818_v22  ;;  %v1091_v22 = vld [vmem:[%s2222_s4 + $0x60] sm:$0xff] }
0x116e   :  { %v887_v23 = vpop.f32.mrb[4].mxu0 }
0x116f   :  { %v892_v24 = vrot.slane %v887_v23, 4  ;;  %v1584_v25 = vpop.f32.mrb[5].mxu0  ;;  %v1092_v23 = vld [vmem:[%s2222_s4 + $0x68] sm:$0xff] }
0x1171   :  { %v894_v27 = vadd.f32 %v892_v24, %v1991_v26  ;;  %v1735_v24 = vpack.c.bf16 %v1092_v23, %v1091_v22 }
0x1173   :  { %1820 = vtanh.f32 %v894_v27  ;;  %v1406_v30 = vmul.f32 -1.442695, %v894_v27  ;;  %v1093_v27 = vld [vmem:[%s2222_s4 + $0x70] sm:$0xff] }
0x1175   :  { %1822 = vpow2.f32 %v1406_v30 }
0x117d   :  { %v1821_v29 = vpop.eup %1820 }
0x117e   :  { %907 = vrot.lane.b32.xlu0 %v1821_v29, %s1845_s18  ;;  %v1094_v29 = vld [vmem:[%s2222_s4 + $0x78] sm:$0xff] }
0x117f   :  { %v1823_v31 = vpop.eup %1822  ;;  %v1739_v30 = vpack.c.bf16 %v1094_v29, %v1093_v27  ;;  %v1410_v29 = vld [vmem:[%s2229_s8] ss:$0 sm:$0xff] }
0x1180   :  { %v898_v32 = vadd.f32 1.0, %v1823_v31 }
0x1182   :  { %1824 = vrcp.f32 %v898_v32 }
0x118c   :  { %v1825_v33 = vpop.eup %1824 }
0x118d   :  { %v905_v37 = vmul.f32 %v1825_v33, %v903_v36 }
0x11f0   :  { %v908_v34 = vpop.permute.xlu0 %907 }
0x11f1   :  { %v910_v35 = vmul.f32 %v1825_v33, %v908_v34 }
0x11f3   :  { %912 = vrot.lane.b32.xlu1 %v910_v35, %s1846_s3 }
0x1265   :  { %v913_v38 = vpop.permute.xlu1 %912 }
0x1266   :  { %v915_v39 = vadd.f32 %v913_v38, %v905_v37 }
0x1268   :  { %1826 = vtanh.f32 %v915_v39 }
0x1272   :  { %v1827_v40 = vpop.eup %1826 }
0x1273   :  { %918 = vrot.lane.b32.xlu0 %v1827_v40, %s1845_s18 }
0x12e5   :  { %v919_v28 = vpop.permute.xlu0 %918 }
0x12e6   :  { %v921_v41 = vmul.f32 %v1825_v33, %v919_v28 }
0x12e8   :  { %v928_v43 = vrot.slane %v921_v41, 4 }
0x12ea   :  { %929 = vrot.lane.b32.xlu1 %v928_v43, %s1846_s3 }
0x135c   :  { %v930_v44 = vpop.permute.xlu1 %929 }
0x135d   :  { %1594 = vmatmul.mubr.msk.f32.vlgmr.msra.gmra.mrb[10].mxu1 %vm148_vm2, %v930_v44 }
0x135e   :  { %1637 = vmatprep.mubr.msk.f32.mxu1 %vm1843_vm0, %v1844_v4 }
0x1430   :  { %v999_v45 = vpop.f32.mrb[10].mxu1 }
0x1431   :  { %v1004_v46 = vrot.slane %v999_v45, 2  ;;  %v1595_v47 = vpop.f32.mrb[11].mxu1 }
0x1433   :  { %v1006_v48 = vadd.f32 %v1004_v46, %v1991_v26  ;;  %v1015_v26 = vrot.slane %v915_v39, 6 }
0x1435   :  { %1828 = vtanh.f32 %v1006_v48  ;;  %v1408_v50 = vmul.f32 -1.442695, %v1006_v48 }
0x1437   :  { %1830 = vpow2.f32 %v1408_v50 }
0x143f   :  { %v1829_v49 = vpop.eup %1828 }
0x1440   :  { %1019 = vrot.lane.b32.xlu0 %v1829_v49, %s1845_s18 }
0x1441   :  { %v1831_v51 = vpop.eup %1830 }
0x1442   :  { %v1010_v52 = vadd.f32 1.0, %v1831_v51 }
0x1444   :  { %1832 = vrcp.f32 %v1010_v52 }
0x144e   :  { %v1833_v53 = vpop.eup %1832 }
0x144f   :  { %v1017_v56 = vmul.f32 %v1833_v53, %v1015_v26 }
0x14b2   :  { %v1020_v54 = vpop.permute.xlu0 %1019 }
0x14b3   :  { %v1022_v55 = vmul.f32 %v1833_v53, %v1020_v54 }
0x14b5   :  { %1024 = vrot.lane.b32.xlu1 %v1022_v55, %s1846_s3 }
0x14b9   :  { %363 = vrot.lane.b32.xlu1 %v2017_v61, %s1846_s3 }
0x14bd   :  { %591 = vrot.lane.b32.xlu1 %v2047_v42, %s1846_s3 }
0x14c1   :  { %923 = vrot.lane.b32.xlu1 %v921_v41, %s1846_s3 }
0x1527   :  { %v1025_v57 = vpop.permute.xlu1 %1024 }
0x1528   :  { %v1027_v58 = vadd.f32 %v1025_v57, %v1017_v56  ;;  %v1201_v56 = vld [vmem:[%s2223_s7] sm:$0xff]  ;;  %v1202_v57 = vld [vmem:[%s2223_s7 + $0x8] sm:$0xff] }
0x152a   :  { %1834 = vtanh.f32 %v1027_v58  ;;  %v1744_v58 = vpack.c.bf16 %v1202_v57, %v1201_v56 }
0x152b   :  { %v364_v59 = vpop.permute.xlu1 %363 }
0x152c   :  { %367 = vst.msk [vmem:[#allocation2] sm:$0xc] %vm366_vm5, %v364_v59  ;;  %1745 = vmatpush3.bf16.msra.mxu1 %v1744_v58 }
0x152d   :  { %369 = vst.msk [vmem:[#allocation2 + $0xa] sm:$0xc] %vm368_vm6, %v364_v59  ;;  %1635 = vmatprep.subr.mxu1 %v1844_v4  ;;  %v1203_v59 = vld [vmem:[%s2223_s7 + $0x10] sm:$0xff] }
0x152f   :  { %v592_v61 = vpop.permute.xlu1 %591 }
0x1530   :  { %595 = vst.msk [vmem:[#allocation2] sm:$0xc0] %vm594_vm7, %v592_v61  ;;  %1636 = vmatpush3.msra.mxu1 %v1203_v59 }
0x1531   :  { %597 = vst.msk [vmem:[#allocation2 + $0x2] sm:$0xc0] %vm596_vm8, %v592_v61  ;;  %v1848_v61 = vmov 0   ;;  %1746 = vmatprep.subr.bf16.mxu1 %v1842_v3  ;;  %v1179_v3 = vld [vmem:[%s2227_s6] sm:$0xff] }
0x1532   :  { %705 = vst.msk [vmem:[#allocation2 + $0x8] sm:$0x3] %vm255_vm3, %v2062_v63  ;;  %1771 = vset.pattern.permute.xlu0 %v1848_v61 }
0x1533   :  { %706 = vst.msk [vmem:[#allocation2 + $0x6] sm:$0x3] %vm257_vm4, %v2062_v63  ;;  %v924_v42 = vpop.permute.xlu1 %923 }
0x1534   :  { %v1835_v60 = vpop.eup %1834  ;;  %926 = vst.msk [vmem:[#allocation2 + $0x8] sm:$0x30] %vm480_vm9, %v924_v42 }
0x1535   :  { %927 = vst.msk [vmem:[#allocation2 - $0x2] sm:$0x30] %vm482_vm10, %v924_v42  ;;  %1030 = vrot.lane.b32.xlu0 %v1835_v60, %s1845_s18  ;;  %v1286_v42 = vld [vmem:[%s2224_s11] sm:$0x3]  ;;  %v1292_v60 = vstv %s1291_s22 }
0x1539   :  { %477 = vrot.lane.b32.xlu0 %v2032_v21, %s1846_s3  ;;  %v1080_v21 = vld [vmem:[%s2222_s4 + $0x8] sm:$0xff] }
0x153a   :  { %v1711_v5 = vpack.c.bf16 %v1080_v21, %v1079_v1  ;;  %v1409_v1 = vld [vmem:[%s2226_s5] ss:$0 sm:$0xff] }
0x153c   :  { %1712 = vmatprep.subr.bf16.mxu0 %v1711_v5 }
0x153d   :  { %811 = vrot.lane.b32.xlu0 %v2076_v19, %s1846_s3  ;;  %1714 = vmatpush3.bf16.msra.mxu0 %v1711_v5  ;;  %v1090_v19 = vld [vmem:[%s2222_s4 + $0x58] sm:$0xff]  ;;  %s1847_s4 = smov 96  }
0x153e   :  { %1716 = vmatprep.subr.bf16.mxu0 %v1715_v7  ;;  %v1731_v20 = vpack.c.bf16 %v1090_v19, %v1089_v18 }
0x1541   :  { %1718 = vmatpush3.bf16.msra.mxu0 %v1715_v7 }
0x1542   :  { %1720 = vmatprep.subr.bf16.mxu0 %v1719_v10 }
0x1545   :  { %1722 = vmatpush3.bf16.msra.mxu0 %v1719_v10  ;;  %v1180_v10 = vld [vmem:[%s2227_s6 + $0x8] sm:$0x3f] }
0x1546   :  { %1724 = vmatprep.subr.bf16.mxu0 %v1723_v13 }
0x1549   :  { %1726 = vmatpush3.bf16.msra.mxu0 %v1723_v13 }
0x154a   :  { %1728 = vmatprep.subr.bf16.mxu0 %v1727_v16 }
0x154d   :  { %1730 = vmatpush3.bf16.msra.mxu0 %v1727_v16 }
0x154e   :  { %1732 = vmatprep.subr.bf16.mxu0 %v1731_v20 }
0x1551   :  { %1734 = vmatpush3.bf16.msra.mxu0 %v1731_v20 }
0x1552   :  { %1736 = vmatprep.subr.bf16.mxu0 %v1735_v24 }
0x1555   :  { %1738 = vmatpush3.bf16.msra.mxu0 %v1735_v24  ;;  %v1302_v24 = vld [vmem:[%s2228_s9] sm:$0xff] }
0x1556   :  { %1740 = vmatprep.subr.bf16.mxu0 %v1739_v30 }
0x1559   :  { %1742 = vmatpush3.bf16.msra.mxu0 %v1739_v30 }
0x15a7   :  { %v1031_v62 = vpop.permute.xlu0 %1030 }
0x15a8   :  { %v1033_v63 = vmul.f32 %v1833_v53, %v1031_v62  ;;  %v1293_v62 = vmul.f32 %v1292_v60, %v1286_v42 }
0x15aa   :  { %1035 = vrot.lane.b32.xlu0 %v1033_v63, %s1846_s3  ;;  %v1294_v63 = vmul.f32 1.442695, %v1293_v62 }
0x15ab   :  { %v478_v0 = vpop.permute.xlu0 %477 }
0x15ac   :  { %481 = vst.msk [vmem:[#allocation2] sm:$0x30] %vm480_vm9, %v478_v0  ;;  %1836 = vpow2.f32 %v1294_v63 }
0x15ad   :  { %483 = vst.msk [vmem:[#allocation2 + $0x6] sm:$0x30] %vm482_vm10, %v478_v0 }
0x15af   :  { %v812_v9 = vpop.permute.xlu0 %811 }
0x15b0   :  { %814 = vst.msk [vmem:[#allocation2 + $0x8] sm:$0xc] %vm366_vm5, %v812_v9 }
0x15b1   :  { %815 = vst.msk [vmem:[#allocation2 + $0x2] sm:$0xc] %vm368_vm6, %v812_v9 }
0x15b6   :  { %v1837_v0 = vpop.eup %1836 }
0x15b7   :  { %v1046_v38 = vld [vmem:[#allocation2 + $0x6] sm:$0xff] }
0x15b8   :  { %v1044_v31 = vld [vmem:[#allocation2 + $0x4] sm:$0xff] }
0x15b9   :  { %v1042_v33 = vld [vmem:[#allocation2 + $0x2] sm:$0xff] }
0x15ba   :  { %v1041_v46 = vld [vmem:[#allocation2 + $0x8] sm:$0x3f] }
0x161c   :  { %v1036_v25 = vpop.permute.xlu0 %1035 }
0x161d   :  { %1038 = vst.msk [vmem:[#allocation2 + $0x8] sm:$0xc0] %vm594_vm7, %v1036_v25 }
0x161e   :  { %1039 = vst.msk [vmem:[#allocation2 - $0x6] sm:$0xc0] %vm596_vm8, %v1036_v25  ;;  %v1303_v25 = vld [vmem:[%s2228_s9 + $0x8] sm:$0xff] }
0x161f   :  { %v1747_v27 = vpack.c.bf16 %v1303_v25, %v1302_v24 }
0x1624   :  { %v1045_v32 = vld [vmem:[#allocation2 + $0xc] sm:$0x3f] }
0x1625   :  { %v1043_v34 = vld [vmem:[#allocation2 + $0xa] sm:$0x3f]  ;;  %v1761_v35 = vpack.i.bf16 %v1045_v32, %v1044_v31  ;;  %v1040_v47 = vld [vmem:[#allocation2] sm:$0xff] }
0x1626   :  { %v1756_v36 = vpack.i.bf16 %v1043_v34, %v1042_v33  ;;  %v1047_v37 = vld [vmem:[#allocation2 + $0xe] sm:$0x3f] }
0x1627   :  { %1762 = vrot.lane.b32.xlu0 %v1761_v35, %s1845_s18  ;;  %v1766_v39 = vpack.i.bf16 %v1047_v37, %v1046_v38  ;;  %v1412_v35 = vld [vmem:[%s2230_s10] ss:$0 sm:$0xff] }
0x1628   :  { %1757 = vrot.lane.b32.xlu1 %v1756_v36, %s1846_s3 }
0x162b   :  { %1298 = vperm.xlu0 %1771, %v1837_v0  }
0x162c   :  { %1767 = vrot.lane.b32.xlu1 %v1766_v39, %s1847_s4 }
0x1699   :  { %v1763_v40 = vpop.permute.xlu0 %1762 }
0x169a   :  { %v1758_v28 = vpop.permute.xlu1 %1757  ;;  %v1765_v44 = vunpack.i.h.bf16 %v1763_v40  ;;  %v1764_v45 = vunpack.i.l.bf16 %v1763_v40 }
0x169b   :  { %v1760_v41 = vunpack.i.h.bf16 %v1758_v28  ;;  %v1759_v43 = vunpack.i.l.bf16 %v1758_v28 }
0x169d   :  { %v1073_v48 = vsel %vm148_vm2, %v1041_v46, %v1760_v41  ;;  %v1072_v49 = vsel %vm148_vm2, %v1040_v47, %v1759_v43 }
0x169e   :  { %v1768_v50 = vpop.permute.xlu1 %1767  ;;  %v1074_v53 = vsel %vm62_vm1, %v1072_v49, %v1764_v45  ;;  %v1075_v54 = vsel %vm62_vm1, %v1073_v48, %v1765_v44 }
0x169f   :  { %v1770_v51 = vunpack.i.h.bf16 %v1768_v50  ;;  %v1769_v52 = vunpack.i.l.bf16 %v1768_v50 }
0x16a1   :  { %v1077_v55 = vsel %vm1076_vm12, %v1074_v53, %v1769_v52  ;;  %v1078_v26 = vsel %vm1076_vm12, %v1075_v54, %v1770_v51 }
0x16a2   :  { %1628 = vmatprep.mubr.f32.mxu0 %v1077_v55 }
0x16a3   :  { %1629 = vmatmul.mubr.f32.vlgmr.msra.gmra.mrb[6].mxu0 %v1078_v26 }
0x16aa   :  { %v1299_v33 = vpop.permute.xlu0 %1298 }
0x1776   :  { %v1630_v21 = vpop.f32.mrb[6].mxu0 }
0x1777   :  { %v1168_v2 = vpop.f32.mrb[7].mxu0  ;;  %v1174_v6 = vadd.f32 %v1630_v21, %v1409_v1 }
0x1778   :  { %v1169_v5 = vadd.f32 %v1409_v1, %v1168_v2 }
0x1779   :  { %v1178_v8 = vmax.f32 %v1174_v6, 0.0 }
0x177a   :  { %v1177_v7 = vmax.f32 %v1169_v5, 0.0 }
0x177b   :  { %v1182_v13 = vadd.f32 %v1180_v10, %v1178_v8 }
0x177c   :  { %v1181_v12 = vadd.f32 %v1179_v3, %v1177_v7 }
0x177d   :  { %v1195_v18 = vrot.slane %v1182_v13, 2  ;;  %v1198_v20 = vrot.slane %v1182_v13, 4 }
0x177e   :  { %v1184_v9 = vrot.slane %v1181_v12, 2  ;;  %v1187_v17 = vrot.slane %v1181_v12, 4  ;;  %v1190_v15 = vrot.slane %v1181_v12, 6 }
0x1780   :  { %v1186_v11 = vmax.f32 %v1181_v12, %v1184_v9 }
0x1782   :  { %v1189_v14 = vmax.f32 %v1186_v11, %v1187_v17 }
0x1784   :  { %v1192_v16 = vmax.f32 %v1189_v14, %v1190_v15 }
0x1786   :  { %v1193_v19 = vmax.f32 %v1192_v16, %v1182_v13 }
0x1788   :  { %v1197_v22 = vmax.f32 %v1193_v19, %v1195_v18 }
0x178a   :  { %v1200_v23 = vmax.f32 %v1197_v22, %v1198_v20 }
0x178c   :  { %1638 = vmatmul.mubr.msk.f32.vlgmr.msra.gmra.mrb[12].mxu1 %vm1211_vm13, %v1200_v23 }
0x178d   :  { %1644 = vmatprep.mubr.msk.f32.mxu1 %vm1843_vm0, %v1844_v4  ;;  %1748 = vmatpush3.bf16.msra.mxu1 %v1747_v27 }
0x185f   :  { %v1281_v30 = vpop.f32.mrb[12].mxu1 }
0x1860   :  { %v1282_v31 = vadd.f32 %v1410_v29, %v1281_v30  ;;  %v1639_v32 = vpop.f32.mrb[13].mxu1 }
0x1862   :  { %1838 = vtanh.f32 %v1282_v31 }
0x186c   :  { %v1839_v4 = vpop.eup %1838 }
0x186d   :  { %v1301_v34 = vmul.f32 %v1839_v4, %v1299_v33 }
0x186f   :  { %1645 = vmatmul.mubr.msk.f32.vlgmr.msra.gmra.mrb[14].mxu1 %vm1311_vm14, %v1301_v34 }
0x1942   :  { %v1381_v36 = vpop.f32.mrb[14].mxu1 }
0x1943   :  { %v1382_v37 = vadd.f32 %v1412_v35, %v1381_v36  ;;  %v1646_v38 = vpop.f32.mrb[15].mxu1 }
0x1945   :  { %1840 = vtanh.f32 %v1382_v37 }
0x194f   :  { %v1841_v39 = vpop.eup %1840 }
0x1950   :  { %1386 = vst.msk [vmem:[%s2231_s13] sm:$0x3] %vm255_vm3, %v1841_v39 }

</bundles_post_ra>
